<compile_context>
chip_gen: v7x
topology: tpu7x:2x2x1
jax: 0.10.0
libtpu: 0.0.40
codegen_flags: <defaults>
</compile_context>

<pallas_src>
import functools
import math

import jax
import jax.numpy as jnp
from jax.experimental import pallas as pl
from jax.experimental.pallas import tpu as pltpu


def _mha_kernel(q_ref, h_ref, wq_ref, wk_ref, wv_ref, wo_ref, out_ref, *rest,
                norm_factor, n_heads, key_dim, val_dim, fast_math, with_attn):
    if with_attn:
        attn_ref, heads_ref = rest
    else:
        (heads_ref,) = rest

    mxu = jnp.bfloat16 if fast_math else jnp.float32
    bb, n_query, input_dim = q_ref.shape
    graph_size = h_ref.shape[1]
    embed_dim = wo_ref.shape[-1]

    # Fold (batch_block, seq) into one M dimension for the wide projection matmuls.
    qx = q_ref[...].reshape(bb * n_query, input_dim).astype(mxu)
    hx = h_ref[...].reshape(bb * graph_size, input_dim).astype(mxu)
    wq = wq_ref[...].astype(mxu)
    wk = wk_ref[...].astype(mxu)
    wv = wv_ref[...].astype(mxu)
    wo = wo_ref[...].astype(mxu)

    # Head-folded projections: one large MXU matmul each (N = n_heads * dim).
    Q = jnp.dot(qx, wq, preferred_element_type=jnp.float32)    # (bb*nq, H*kd)
    K = jnp.dot(hx, wk, preferred_element_type=jnp.float32)    # (bb*gs, H*kd)
    V = jnp.dot(hx, wv, preferred_element_type=jnp.float32)    # (bb*gs, H*vd)

    # Re-expose the batch_block axis so the per-head attention matmuls are batched
    # 3-D dots over the whole block (no per-batch-element Python loop).  MXU operands
    # are bf16 under fast_math (v6e/v7x), f32 otherwise; softmax math stays f32.
    Q3 = Q.reshape(bb, n_query, n_heads * key_dim).astype(mxu)
    K3 = K.reshape(bb, graph_size, n_heads * key_dim).astype(mxu)
    V3 = V.reshape(bb, graph_size, n_heads * val_dim).astype(mxu)

    for hd in range(n_heads):                                  # static, small
        Qh = Q3[:, :, hd * key_dim:(hd + 1) * key_dim]         # (bb, nq, kd)
        Kh = K3[:, :, hd * key_dim:(hd + 1) * key_dim]         # (bb, gs, kd)
        Vh = V3[:, :, hd * val_dim:(hd + 1) * val_dim]         # (bb, gs, vd)

        # Contract key_dim of both operands: no explicit K transpose / XLU shuffle.
        scores = norm_factor * jnp.einsum(
            'bqd,bkd->bqk', Qh, Kh, preferred_element_type=jnp.float32)

        m = jnp.max(scores, axis=-1, keepdims=True)
        e = jnp.exp(scores - m)
        denom = jnp.sum(e, axis=-1, keepdims=True)
        if fast_math:
            attn = e * pl.reciprocal(denom, approx=True)       # EUP, off the VALU path
        else:
            attn = e / denom

        if with_attn:
            # Lane-dense attn block: all heads of a row share one contiguous lane slab.
            attn_ref[:, :, hd * graph_size:(hd + 1) * graph_size] = (
                attn.astype(attn_ref.dtype))

        head_out = jnp.einsum('bqk,bkv->bqv', attn.astype(mxu), Vh,
                              preferred_element_type=jnp.float32)
        # Write straight into the VMEM scratch at lane offset h*val_dim
        # (no Python-list accumulation / concatenate).
        heads_ref[:, :, hd * val_dim:(hd + 1) * val_dim] = head_out

    # Single head-folded output projection (K = n_heads*val_dim) for the whole block.
    heads = heads_ref[...].reshape(bb * n_query, n_heads * val_dim).astype(mxu)
    out = jnp.dot(heads, wo, preferred_element_type=jnp.float32)
    out_ref[...] = out.reshape(bb, n_query, embed_dim).astype(out_ref.dtype)


def _default_vmem_limit_bytes():
    # v5e/v6e have 128 MiB physical VMEM, v7x only 64 MiB: derive the scoped limit
    # from the actual chip instead of hardcoding the 32 MiB default.
    try:
        cap = int(pltpu.get_tpu_info().vmem_capacity_bytes)
    except Exception:
        cap = 64 * 1024 * 1024
    return max(32 * 1024 * 1024, min((cap * 3) // 4, 96 * 1024 * 1024))


def _pick_batch_block(batch, n_query, graph_size, n_heads, key_dim, val_dim,
                      input_dim, embed_dim, return_attn, attn_bytes,
                      vmem_limit_bytes, min_rows=256, max_rows=1024):
    """Pick batch_block so the fused projections have M = bb*n_query >= min_rows when
    possible, while keeping >= 2 grid steps (v7x megacore) and fitting a conservative
    double-buffered VMEM estimate (re-derived per chip via vmem_limit_bytes)."""

    def est_bytes(bb):
        rows_q, rows_h = bb * n_query, bb * graph_size
        b = 2 * rows_q * input_dim * 4                       # q block (double-buffered)
        b += 2 * rows_h * input_dim * 4                      # h block
        b += 2 * rows_q * embed_dim * 4                      # out block
        if return_attn:
            b += 2 * rows_q * n_heads * graph_size * attn_bytes
        b += rows_q * n_heads * val_dim * 4                  # heads scratch
        b += 2 * input_dim * n_heads * (2 * key_dim + val_dim) * 4   # wq/wk/wv resident
        b += 2 * n_heads * val_dim * embed_dim * 4                   # wo resident
        return b

    budget = int(vmem_limit_bytes * 0.6)
    feasible = [d for d in range(1, batch + 1)
                if batch % d == 0
                and d * n_query <= max_rows
                and est_bytes(d) <= budget
                and (batch // d >= 2 or batch < 2)]
    if not feasible:
        return 1
    for d in feasible:                      # smallest bb that already reaches min_rows
        if d * n_query >= min_rows:
            return d
    return feasible[-1]                     # otherwise largest admissible bb


def multi_head_attention(q, W_query, W_key, W_val, W_out, h=None, *,
                         batch_block=None, fast_math=False, return_attn=True,
                         attn_dtype=jnp.bfloat16, vmem_limit_bytes=None):
    """Pallas implementation of MultiHeadAttention.forward(q, W..., h=h, mask=None)."""
    if h is None:
        h = q
    batch, n_query, input_dim = q.shape
    graph_size = h.shape[1]
    assert h.shape[0] == batch and h.shape[2] == input_dim, "h/q shape mismatch"
    n_heads, _, key_dim = W_query.shape
    val_dim = W_val.shape[-1]
    embed_dim = W_out.shape[-1]
    norm_factor = 1.0 / math.sqrt(key_dim)

    if vmem_limit_bytes is None:
        vmem_limit_bytes = _default_vmem_limit_bytes()
    attn_bytes = jnp.dtype(attn_dtype).itemsize
    if batch_block is None:
        batch_block = _pick_batch_block(batch, n_query, graph_size, n_heads, key_dim,
                                        val_dim, input_dim, embed_dim, return_attn,
                                        attn_bytes, vmem_limit_bytes)
    elif batch_block <= 0 or batch % batch_block != 0:
        batch_block = 1
    nb = batch // batch_block

    # Wrapper-side layout plumbing: fold the head axis into the weights so projections
    # and the output projection are single wide MXU matmuls inside the kernel.
    #   Wq_f[i, h*kd + d] = W_query[h, i, d]   (same for key/val)
    #   Wo_f[h*vd + v, e] = W_out[h, v, e]     (matches torch's .view(-1, embed_dim))
    wq_f = jnp.transpose(W_query, (1, 0, 2)).reshape(input_dim, n_heads * key_dim)
    wk_f = jnp.transpose(W_key, (1, 0, 2)).reshape(input_dim, n_heads * key_dim)
    wv_f = jnp.transpose(W_val, (1, 0, 2)).reshape(input_dim, n_heads * val_dim)
    wo_f = W_out.reshape(n_heads * val_dim, embed_dim)

    kernel = functools.partial(
        _mha_kernel, norm_factor=norm_factor, n_heads=n_heads, key_dim=key_dim,
        val_dim=val_dim, fast_math=fast_math, with_attn=return_attn)

    const2 = lambda i: (0, 0)
    in_specs = [
        pl.BlockSpec((batch_block, n_query, input_dim), lambda i: (i, 0, 0)),
        pl.BlockSpec((batch_block, graph_size, input_dim), lambda i: (i, 0, 0)),
        # Weights: full arrays, constant block index -> DMA'd once, VMEM-resident.
        # (Single-buffering them via pipeline_mode=pl.Buffered(1) would halve their
        # footprint; left at the default for lowering robustness.)
        pl.BlockSpec((input_dim, n_heads * key_dim), const2),
        pl.BlockSpec((input_dim, n_heads * key_dim), const2),
        pl.BlockSpec((input_dim, n_heads * val_dim), const2),
        pl.BlockSpec((n_heads * val_dim, embed_dim), const2),
    ]
    out_spec_main = pl.BlockSpec((batch_block, n_query, embed_dim), lambda i: (i, 0, 0))
    if return_attn:
        out_shape = (
            jax.ShapeDtypeStruct((batch, n_query, embed_dim), q.dtype),
            # Lane-dense attn writeback: last dim = n_heads * graph_size.
            jax.ShapeDtypeStruct((batch, n_query, n_heads * graph_size), attn_dtype),
        )
        out_specs = [
            out_spec_main,
            pl.BlockSpec((batch_block, n_query, n_heads * graph_size),
                         lambda i: (i, 0, 0)),
        ]
    else:
        out_shape = jax.ShapeDtypeStruct((batch, n_query, embed_dim), q.dtype)
        out_specs = out_spec_main

    result = pl.pallas_call(
        kernel,
        out_shape=out_shape,
        grid_spec=pltpu.PrefetchScalarGridSpec(
            num_scalar_prefetch=0,
            grid=(nb,),  # single "parallel" batch-block axis
            in_specs=in_specs,
            out_specs=out_specs,
            scratch_shapes=[
                pltpu.VMEM((batch_block, n_query, n_heads * val_dim), jnp.float32),
            ],
        ),
        compiler_params=pltpu.CompilerParams(
            dimension_semantics=("parallel",),
            vmem_limit_bytes=int(vmem_limit_bytes),
        ),
    )(q, h, wq_f, wk_f, wv_f, wo_f)

    if return_attn:
        out, attn_flat = result
        # Recover the module's (n_heads, batch, n_query, graph_size) layout wrapper-side.
        attn = jnp.transpose(
            attn_flat.reshape(batch, n_query, n_heads, graph_size), (2, 0, 1, 3))
        return out, attn
    return result, None


def _reference(q, h, W_query, W_key, W_val, W_out):
    """Pure-JAX reference mirroring the PyTorch forward exactly (mask=None)."""
    batch, n_query, input_dim = q.shape
    graph_size = h.shape[1]
    n_heads, _, key_dim = W_query.shape
    val_dim = W_val.shape[-1]
    embed_dim = W_out.shape[-1]
    norm = 1.0 / math.sqrt(key_dim)
    hi = "highest"

    qflat = q.reshape(-1, input_dim)
    hflat = h.reshape(-1, input_dim)
    Q = jnp.matmul(qflat, W_query, precision=hi).reshape(n_heads, batch, n_query, key_dim)
    K = jnp.matmul(hflat, W_key, precision=hi).reshape(n_heads, batch, graph_size, key_dim)
    V = jnp.matmul(hflat, W_val, precision=hi).reshape(n_heads, batch, graph_size, val_dim)
    compat = norm * jnp.matmul(Q, jnp.swapaxes(K, 2, 3), precision=hi)
    attn = jax.nn.softmax(compat, axis=-1)
    heads = jnp.matmul(attn, V, precision=hi)
    out = jnp.matmul(
        jnp.transpose(heads, (1, 2, 0, 3)).reshape(-1, n_heads * val_dim),
        W_out.reshape(-1, embed_dim), precision=hi,
    ).reshape(batch, n_query, embed_dim)
    return out, attn


if __name__ == "__main__":
    # Small deterministic configuration consistent with the module.
    n_heads, input_dim, embed_dim = 4, 32, 32
    key_dim = val_dim = embed_dim // n_heads          # 8
    batch, n_query, graph_size = 4, 8, 16

    key = jax.random.PRNGKey(0)
    kq, kh, kWq, kWk, kWv, kWo = jax.random.split(key, 6)

    # Parameters as in init_parameters(): U(-1/sqrt(dim_last), +1/sqrt(dim_last)).
    def uniform_init(k, shape):
        stdv = 1.0 / math.sqrt(shape[-1])
        return jax.random.uniform(k, shape, jnp.float32, minval=-stdv, maxval=stdv)

    W_query = uniform_init(kWq, (n_heads, input_dim, key_dim))
    W_key = uniform_init(kWk, (n_heads, input_dim, key_dim))
    W_val = uniform_init(kWv, (n_heads, input_dim, val_dim))
    W_out = uniform_init(kWo, (n_heads, val_dim, embed_dim))
    q = jax.random.normal(kq, (batch, n_query, input_dim), jnp.float32)
    h = jax.random.normal(kh, (batch, graph_size, input_dim), jnp.float32)

    # --- Self-attention (h = q), exact f32 MXU path, attn returned in f32.
    out_gold, attn_gold = _reference(q, q, W_query, W_key, W_val, W_out)
    out, attn = multi_head_attention(q, W_query, W_key, W_val, W_out,
                                     fast_math=False, return_attn=True,
                                     attn_dtype=jnp.float32)
    out = jax.block_until_ready(out)
    attn = jax.block_until_ready(attn)
    assert out.shape == (batch, n_query, embed_dim)
    assert attn.shape == (n_heads, batch, n_query, n_query)
    assert jnp.allclose(out, out_gold, atol=1e-4, rtol=1e-4), "out mismatch (self, f32)"
    assert jnp.allclose(attn, attn_gold, atol=1e-4, rtol=1e-3), "attn mismatch (self, f32)"

    # --- Cross-attention (h != q), exact path, attn output skipped (no HBM writeback).
    out_gold_x, _ = _reference(q, h, W_query, W_key, W_val, W_out)
    out_x, attn_x = multi_head_attention(q, W_query, W_key, W_val, W_out, h,
                                         fast_math=False, return_attn=False)
    out_x = jax.block_until_ready(out_x)
    assert attn_x is None
    assert jnp.allclose(out_x, out_gold_x, atol=1e-4, rtol=1e-4), "out mismatch (cross)"

    # --- fast_math: bf16 MXU operands (incl. score matmul) + approx reciprocal,
    #     bf16 attn writeback.  Loose tolerances.
    out_f, attn_f = multi_head_attention(q, W_query, W_key, W_val, W_out,
                                         fast_math=True, return_attn=True)
    out_f = jax.block_until_ready(out_f)
    attn_f = jax.block_until_ready(attn_f)
    assert jnp.allclose(out_f, out_gold, atol=5e-2, rtol=5e-2), "out mismatch (fast)"
    assert jnp.allclose(attn_f.astype(jnp.float32), attn_gold,
                        atol=5e-2, rtol=5e-2), "attn mismatch (fast)"

    print("KERNEL_OK")
</pallas_src>

<mosaic_0001>
module attributes {stable_mosaic.version = 11 : i64} {
  func.func @_mha_kernel(%arg0: i32, %arg1: memref<2x8x32xf32, #tpu.memory_space<vmem>>, %arg2: memref<2x8x32xf32, #tpu.memory_space<vmem>>, %arg3: memref<32x32xf32, #tpu.memory_space<vmem>>, %arg4: memref<32x32xf32, #tpu.memory_space<vmem>>, %arg5: memref<32x32xf32, #tpu.memory_space<vmem>>, %arg6: memref<32x32xf32, #tpu.memory_space<vmem>>, %arg7: memref<2x8x32xf32, #tpu.memory_space<vmem>>, %arg8: memref<2x8x32xf32, #tpu.memory_space<vmem>>, %arg9: memref<2x8x32xf32, #tpu.memory_space<vmem>>) attributes {dimension_semantics = [#tpu.dimension_semantics<parallel>], iteration_bounds = array<i64: 2>, scalar_prefetch = 0 : i64, scratch_operands = 1 : i64, tpu.core_type = #tpu.core_type<tc>, window_params = [{transform_indices = @transform_0, window_bounds = array<i64: 2, 8, 32>}, {transform_indices = @transform_1, window_bounds = array<i64: 2, 8, 32>}, {pipeline_mode = #tpu.pipeline_mode<synchronous>, transform_indices = @transform_2, window_bounds = array<i64: 32, 32>}, {pipeline_mode = #tpu.pipeline_mode<synchronous>, transform_indices = @transform_3, window_bounds = array<i64: 32, 32>}, {pipeline_mode = #tpu.pipeline_mode<synchronous>, transform_indices = @transform_4, window_bounds = array<i64: 32, 32>}, {pipeline_mode = #tpu.pipeline_mode<synchronous>, transform_indices = @transform_5, window_bounds = array<i64: 32, 32>}, {transform_indices = @transform_6, window_bounds = array<i64: 2, 8, 32>}, {transform_indices = @transform_7, window_bounds = array<i64: 2, 8, 32>}]} {
    %c0 = arith.constant 0 : index
    %c0_0 = arith.constant 0 : index
    %c0_1 = arith.constant 0 : index
    %0 = vector.load %arg1[%c0, %c0_0, %c0_1] : memref<2x8x32xf32, #tpu.memory_space<vmem>>, vector<2x8x32xf32>
    %1 = vector.shape_cast %0 : vector<2x8x32xf32> to vector<16x32xf32>
    %c0_2 = arith.constant 0 : index
    %c0_3 = arith.constant 0 : index
    %c0_4 = arith.constant 0 : index
    %2 = vector.load %arg2[%c0_2, %c0_3, %c0_4] : memref<2x8x32xf32, #tpu.memory_space<vmem>>, vector<2x8x32xf32>
    %3 = vector.shape_cast %2 : vector<2x8x32xf32> to vector<16x32xf32>
    %c0_5 = arith.constant 0 : index
    %c0_6 = arith.constant 0 : index
    %4 = vector.load %arg3[%c0_5, %c0_6] : memref<32x32xf32, #tpu.memory_space<vmem>>, vector<32x32xf32>
    %c0_7 = arith.constant 0 : index
    %c0_8 = arith.constant 0 : index
    %5 = vector.load %arg4[%c0_7, %c0_8] : memref<32x32xf32, #tpu.memory_space<vmem>>, vector<32x32xf32>
    %c0_9 = arith.constant 0 : index
    %c0_10 = arith.constant 0 : index
    %6 = vector.load %arg5[%c0_9, %c0_10] : memref<32x32xf32, #tpu.memory_space<vmem>>, vector<32x32xf32>
    %c0_11 = arith.constant 0 : index
    %c0_12 = arith.constant 0 : index
    %7 = vector.load %arg6[%c0_11, %c0_12] : memref<32x32xf32, #tpu.memory_space<vmem>>, vector<32x32xf32>
    %cst = arith.constant dense<0.000000e+00> : vector<16x32xf32>
    %8 = tpu.matmul %1, %4, %cst {dimension_numbers = #tpu.dot_dimension_numbers<[1], [0], [0], [1], [0, 0, 1, 1], [], []>} : vector<16x32xf32>, vector<32x32xf32>, vector<16x32xf32> -> vector<16x32xf32>
    %cst_13 = arith.constant dense<0.000000e+00> : vector<16x32xf32>
    %9 = tpu.matmul %3, %5, %cst_13 {dimension_numbers = #tpu.dot_dimension_numbers<[1], [0], [0], [1], [0, 0, 1, 1], [], []>} : vector<16x32xf32>, vector<32x32xf32>, vector<16x32xf32> -> vector<16x32xf32>
    %cst_14 = arith.constant dense<0.000000e+00> : vector<16x32xf32>
    %10 = tpu.matmul %3, %6, %cst_14 {dimension_numbers = #tpu.dot_dimension_numbers<[1], [0], [0], [1], [0, 0, 1, 1], [], []>} : vector<16x32xf32>, vector<32x32xf32>, vector<16x32xf32> -> vector<16x32xf32>
    %11 = vector.shape_cast %8 : vector<16x32xf32> to vector<2x8x32xf32>
    %12 = vector.shape_cast %9 : vector<16x32xf32> to vector<2x8x32xf32>
    %13 = vector.shape_cast %10 : vector<16x32xf32> to vector<2x8x32xf32>
    %14 = vector.extract_strided_slice %11 {offsets = [0, 0, 0], sizes = [2, 8, 8], strides = [1, 1, 1]} : vector<2x8x32xf32> to vector<2x8x8xf32>
    %15 = vector.extract_strided_slice %12 {offsets = [0, 0, 0], sizes = [2, 8, 8], strides = [1, 1, 1]} : vector<2x8x32xf32> to vector<2x8x8xf32>
    %16 = vector.extract_strided_slice %13 {offsets = [0, 0, 0], sizes = [2, 8, 8], strides = [1, 1, 1]} : vector<2x8x32xf32> to vector<2x8x8xf32>
    "tpu.trace_start"() <{level = 10 : i32, message = "bqd,bkd->bqk"}> : () -> ()
    %cst_15 = arith.constant dense<0.000000e+00> : vector<2x8x8xf32>
    %17 = tpu.matmul %14, %15, %cst_15 {dimension_numbers = #tpu.dot_dimension_numbers<[2], [2], [1], [1], [0, 0, 0, 1, 1, 1], [0], [0]>} : vector<2x8x8xf32>, vector<2x8x8xf32>, vector<2x8x8xf32> -> vector<2x8x8xf32>
    "tpu.trace_stop"() : () -> ()
    %cst_16 = arith.constant 0.353553385 : f32
    %18 = vector.broadcast %cst_16 : f32 to vector<2x8x8xf32>
    %19 = arith.mulf %18, %17 : vector<2x8x8xf32>
    %cst_17 = arith.constant dense<0xFF800000> : vector<2x8xf32>
    %20 = vector.multi_reduction <maximumf>, %19, %cst_17 [2] : vector<2x8x8xf32> to vector<2x8xf32>
    %21 = vector.shape_cast %20 : vector<2x8xf32> to vector<2x8x1xf32>
    %22 = vector.broadcast %21 : vector<2x8x1xf32> to vector<2x8x8xf32>
    %23 = arith.subf %19, %22 : vector<2x8x8xf32>
    %24 = math.exp %23 : vector<2x8x8xf32>
    %cst_18 = arith.constant dense<0.000000e+00> : vector<2x8xf32>
    %25 = vector.multi_reduction <add>, %24, %cst_18 [2] : vector<2x8x8xf32> to vector<2x8xf32>
    %26 = vector.shape_cast %25 : vector<2x8xf32> to vector<2x8x1xf32>
    %27 = vector.broadcast %26 : vector<2x8x1xf32> to vector<2x8x8xf32>
    %28 = arith.divf %24, %27 : vector<2x8x8xf32>
    %c0_19 = arith.constant 0 : index
    %c0_20 = arith.constant 0 : index
    %c0_21 = arith.constant 0 : index
    %29 = vector.load %arg8[%c0_19, %c0_20, %c0_21] : memref<2x8x32xf32, #tpu.memory_space<vmem>>, vector<2x8x8xf32>
    tpu.vector_store %arg8[%c0_19, %c0_20, %c0_21], %28 {strides = array<i32>} : memref<2x8x32xf32, #tpu.memory_space<vmem>>, vector<2x8x8xf32>,
    "tpu.trace_start"() <{level = 10 : i32, message = "bqk,bkv->bqv"}> : () -> ()
    %cst_22 = arith.constant dense<0.000000e+00> : vector<2x8x8xf32>
    %30 = tpu.matmul %28, %16, %cst_22 {dimension_numbers = #tpu.dot_dimension_numbers<[2], [1], [1], [2], [0, 0, 0, 1, 1, 2], [0], [0]>} : vector<2x8x8xf32>, vector<2x8x8xf32>, vector<2x8x8xf32> -> vector<2x8x8xf32>
    "tpu.trace_stop"() : () -> ()
    %c0_23 = arith.constant 0 : index
    %c0_24 = arith.constant 0 : index
    %c0_25 = arith.constant 0 : index
    %31 = vector.load %arg9[%c0_23, %c0_24, %c0_25] : memref<2x8x32xf32, #tpu.memory_space<vmem>>, vector<2x8x8xf32>
    tpu.vector_store %arg9[%c0_23, %c0_24, %c0_25], %30 {strides = array<i32>} : memref<2x8x32xf32, #tpu.memory_space<vmem>>, vector<2x8x8xf32>,
    %32 = vector.extract_strided_slice %11 {offsets = [0, 0, 8], sizes = [2, 8, 8], strides = [1, 1, 1]} : vector<2x8x32xf32> to vector<2x8x8xf32>
    %33 = vector.extract_strided_slice %12 {offsets = [0, 0, 8], sizes = [2, 8, 8], strides = [1, 1, 1]} : vector<2x8x32xf32> to vector<2x8x8xf32>
    %34 = vector.extract_strided_slice %13 {offsets = [0, 0, 8], sizes = [2, 8, 8], strides = [1, 1, 1]} : vector<2x8x32xf32> to vector<2x8x8xf32>
    "tpu.trace_start"() <{level = 10 : i32, message = "bqd,bkd->bqk"}> : () -> ()
    %cst_26 = arith.constant dense<0.000000e+00> : vector<2x8x8xf32>
    %35 = tpu.matmul %32, %33, %cst_26 {dimension_numbers = #tpu.dot_dimension_numbers<[2], [2], [1], [1], [0, 0, 0, 1, 1, 1], [0], [0]>} : vector<2x8x8xf32>, vector<2x8x8xf32>, vector<2x8x8xf32> -> vector<2x8x8xf32>
    "tpu.trace_stop"() : () -> ()
    %cst_27 = arith.constant 0.353553385 : f32
    %36 = vector.broadcast %cst_27 : f32 to vector<2x8x8xf32>
    %37 = arith.mulf %36, %35 : vector<2x8x8xf32>
    %cst_28 = arith.constant dense<0xFF800000> : vector<2x8xf32>
    %38 = vector.multi_reduction <maximumf>, %37, %cst_28 [2] : vector<2x8x8xf32> to vector<2x8xf32>
    %39 = vector.shape_cast %38 : vector<2x8xf32> to vector<2x8x1xf32>
    %40 = vector.broadcast %39 : vector<2x8x1xf32> to vector<2x8x8xf32>
    %41 = arith.subf %37, %40 : vector<2x8x8xf32>
    %42 = math.exp %41 : vector<2x8x8xf32>
    %cst_29 = arith.constant dense<0.000000e+00> : vector<2x8xf32>
    %43 = vector.multi_reduction <add>, %42, %cst_29 [2] : vector<2x8x8xf32> to vector<2x8xf32>
    %44 = vector.shape_cast %43 : vector<2x8xf32> to vector<2x8x1xf32>
    %45 = vector.broadcast %44 : vector<2x8x1xf32> to vector<2x8x8xf32>
    %46 = arith.divf %42, %45 : vector<2x8x8xf32>
    %c0_30 = arith.constant 0 : index
    %c0_31 = arith.constant 0 : index
    %c8 = arith.constant 8 : index
    %47 = vector.load %arg8[%c0_30, %c0_31, %c8] : memref<2x8x32xf32, #tpu.memory_space<vmem>>, vector<2x8x8xf32>
    tpu.vector_store %arg8[%c0_30, %c0_31, %c8], %46 {strides = array<i32>} : memref<2x8x32xf32, #tpu.memory_space<vmem>>, vector<2x8x8xf32>,
    "tpu.trace_start"() <{level = 10 : i32, message = "bqk,bkv->bqv"}> : () -> ()
    %cst_32 = arith.constant dense<0.000000e+00> : vector<2x8x8xf32>
    %48 = tpu.matmul %46, %34, %cst_32 {dimension_numbers = #tpu.dot_dimension_numbers<[2], [1], [1], [2], [0, 0, 0, 1, 1, 2], [0], [0]>} : vector<2x8x8xf32>, vector<2x8x8xf32>, vector<2x8x8xf32> -> vector<2x8x8xf32>
    "tpu.trace_stop"() : () -> ()
    %c0_33 = arith.constant 0 : index
    %c0_34 = arith.constant 0 : index
    %c8_35 = arith.constant 8 : index
    %49 = vector.load %arg9[%c0_33, %c0_34, %c8_35] : memref<2x8x32xf32, #tpu.memory_space<vmem>>, vector<2x8x8xf32>
    tpu.vector_store %arg9[%c0_33, %c0_34, %c8_35], %48 {strides = array<i32>} : memref<2x8x32xf32, #tpu.memory_space<vmem>>, vector<2x8x8xf32>,
    %50 = vector.extract_strided_slice %11 {offsets = [0, 0, 16], sizes = [2, 8, 8], strides = [1, 1, 1]} : vector<2x8x32xf32> to vector<2x8x8xf32>
    %51 = vector.extract_strided_slice %12 {offsets = [0, 0, 16], sizes = [2, 8, 8], strides = [1, 1, 1]} : vector<2x8x32xf32> to vector<2x8x8xf32>
    %52 = vector.extract_strided_slice %13 {offsets = [0, 0, 16], sizes = [2, 8, 8], strides = [1, 1, 1]} : vector<2x8x32xf32> to vector<2x8x8xf32>
    "tpu.trace_start"() <{level = 10 : i32, message = "bqd,bkd->bqk"}> : () -> ()
    %cst_36 = arith.constant dense<0.000000e+00> : vector<2x8x8xf32>
    %53 = tpu.matmul %50, %51, %cst_36 {dimension_numbers = #tpu.dot_dimension_numbers<[2], [2], [1], [1], [0, 0, 0, 1, 1, 1], [0], [0]>} : vector<2x8x8xf32>, vector<2x8x8xf32>, vector<2x8x8xf32> -> vector<2x8x8xf32>
    "tpu.trace_stop"() : () -> ()
    %cst_37 = arith.constant 0.353553385 : f32
    %54 = vector.broadcast %cst_37 : f32 to vector<2x8x8xf32>
    %55 = arith.mulf %54, %53 : vector<2x8x8xf32>
    %cst_38 = arith.constant dense<0xFF800000> : vector<2x8xf32>
    %56 = vector.multi_reduction <maximumf>, %55, %cst_38 [2] : vector<2x8x8xf32> to vector<2x8xf32>
    %57 = vector.shape_cast %56 : vector<2x8xf32> to vector<2x8x1xf32>
    %58 = vector.broadcast %57 : vector<2x8x1xf32> to vector<2x8x8xf32>
    %59 = arith.subf %55, %58 : vector<2x8x8xf32>
    %60 = math.exp %59 : vector<2x8x8xf32>
    %cst_39 = arith.constant dense<0.000000e+00> : vector<2x8xf32>
    %61 = vector.multi_reduction <add>, %60, %cst_39 [2] : vector<2x8x8xf32> to vector<2x8xf32>
    %62 = vector.shape_cast %61 : vector<2x8xf32> to vector<2x8x1xf32>
    %63 = vector.broadcast %62 : vector<2x8x1xf32> to vector<2x8x8xf32>
    %64 = arith.divf %60, %63 : vector<2x8x8xf32>
    %c0_40 = arith.constant 0 : index
    %c0_41 = arith.constant 0 : index
    %c16 = arith.constant 16 : index
    %65 = vector.load %arg8[%c0_40, %c0_41, %c16] : memref<2x8x32xf32, #tpu.memory_space<vmem>>, vector<2x8x8xf32>
    tpu.vector_store %arg8[%c0_40, %c0_41, %c16], %64 {strides = array<i32>} : memref<2x8x32xf32, #tpu.memory_space<vmem>>, vector<2x8x8xf32>,
    "tpu.trace_start"() <{level = 10 : i32, message = "bqk,bkv->bqv"}> : () -> ()
    %cst_42 = arith.constant dense<0.000000e+00> : vector<2x8x8xf32>
    %66 = tpu.matmul %64, %52, %cst_42 {dimension_numbers = #tpu.dot_dimension_numbers<[2], [1], [1], [2], [0, 0, 0, 1, 1, 2], [0], [0]>} : vector<2x8x8xf32>, vector<2x8x8xf32>, vector<2x8x8xf32> -> vector<2x8x8xf32>
    "tpu.trace_stop"() : () -> ()
    %c0_43 = arith.constant 0 : index
    %c0_44 = arith.constant 0 : index
    %c16_45 = arith.constant 16 : index
    %67 = vector.load %arg9[%c0_43, %c0_44, %c16_45] : memref<2x8x32xf32, #tpu.memory_space<vmem>>, vector<2x8x8xf32>
    tpu.vector_store %arg9[%c0_43, %c0_44, %c16_45], %66 {strides = array<i32>} : memref<2x8x32xf32, #tpu.memory_space<vmem>>, vector<2x8x8xf32>,
    %68 = vector.extract_strided_slice %11 {offsets = [0, 0, 24], sizes = [2, 8, 8], strides = [1, 1, 1]} : vector<2x8x32xf32> to vector<2x8x8xf32>
    %69 = vector.extract_strided_slice %12 {offsets = [0, 0, 24], sizes = [2, 8, 8], strides = [1, 1, 1]} : vector<2x8x32xf32> to vector<2x8x8xf32>
    %70 = vector.extract_strided_slice %13 {offsets = [0, 0, 24], sizes = [2, 8, 8], strides = [1, 1, 1]} : vector<2x8x32xf32> to vector<2x8x8xf32>
    "tpu.trace_start"() <{level = 10 : i32, message = "bqd,bkd->bqk"}> : () -> ()
    %cst_46 = arith.constant dense<0.000000e+00> : vector<2x8x8xf32>
    %71 = tpu.matmul %68, %69, %cst_46 {dimension_numbers = #tpu.dot_dimension_numbers<[2], [2], [1], [1], [0, 0, 0, 1, 1, 1], [0], [0]>} : vector<2x8x8xf32>, vector<2x8x8xf32>, vector<2x8x8xf32> -> vector<2x8x8xf32>
    "tpu.trace_stop"() : () -> ()
    %cst_47 = arith.constant 0.353553385 : f32
    %72 = vector.broadcast %cst_47 : f32 to vector<2x8x8xf32>
    %73 = arith.mulf %72, %71 : vector<2x8x8xf32>
    %cst_48 = arith.constant dense<0xFF800000> : vector<2x8xf32>
    %74 = vector.multi_reduction <maximumf>, %73, %cst_48 [2] : vector<2x8x8xf32> to vector<2x8xf32>
    %75 = vector.shape_cast %74 : vector<2x8xf32> to vector<2x8x1xf32>
    %76 = vector.broadcast %75 : vector<2x8x1xf32> to vector<2x8x8xf32>
    %77 = arith.subf %73, %76 : vector<2x8x8xf32>
    %78 = math.exp %77 : vector<2x8x8xf32>
    %cst_49 = arith.constant dense<0.000000e+00> : vector<2x8xf32>
    %79 = vector.multi_reduction <add>, %78, %cst_49 [2] : vector<2x8x8xf32> to vector<2x8xf32>
    %80 = vector.shape_cast %79 : vector<2x8xf32> to vector<2x8x1xf32>
    %81 = vector.broadcast %80 : vector<2x8x1xf32> to vector<2x8x8xf32>
    %82 = arith.divf %78, %81 : vector<2x8x8xf32>
    %c0_50 = arith.constant 0 : index
    %c0_51 = arith.constant 0 : index
    %c24 = arith.constant 24 : index
    %83 = vector.load %arg8[%c0_50, %c0_51, %c24] : memref<2x8x32xf32, #tpu.memory_space<vmem>>, vector<2x8x8xf32>
    tpu.vector_store %arg8[%c0_50, %c0_51, %c24], %82 {strides = array<i32>} : memref<2x8x32xf32, #tpu.memory_space<vmem>>, vector<2x8x8xf32>,
    "tpu.trace_start"() <{level = 10 : i32, message = "bqk,bkv->bqv"}> : () -> ()
    %cst_52 = arith.constant dense<0.000000e+00> : vector<2x8x8xf32>
    %84 = tpu.matmul %82, %70, %cst_52 {dimension_numbers = #tpu.dot_dimension_numbers<[2], [1], [1], [2], [0, 0, 0, 1, 1, 2], [0], [0]>} : vector<2x8x8xf32>, vector<2x8x8xf32>, vector<2x8x8xf32> -> vector<2x8x8xf32>
    "tpu.trace_stop"() : () -> ()
    %c0_53 = arith.constant 0 : index
    %c0_54 = arith.constant 0 : index
    %c24_55 = arith.constant 24 : index
    %85 = vector.load %arg9[%c0_53, %c0_54, %c24_55] : memref<2x8x32xf32, #tpu.memory_space<vmem>>, vector<2x8x8xf32>
    tpu.vector_store %arg9[%c0_53, %c0_54, %c24_55], %84 {strides = array<i32>} : memref<2x8x32xf32, #tpu.memory_space<vmem>>, vector<2x8x8xf32>,
    %c0_56 = arith.constant 0 : index
    %c0_57 = arith.constant 0 : index
    %c0_58 = arith.constant 0 : index
    %86 = vector.load %arg9[%c0_56, %c0_57, %c0_58] : memref<2x8x32xf32, #tpu.memory_space<vmem>>, vector<2x8x32xf32>
    %87 = vector.shape_cast %86 : vector<2x8x32xf32> to vector<16x32xf32>
    %cst_59 = arith.constant dense<0.000000e+00> : vector<16x32xf32>
    %88 = tpu.matmul %87, %7, %cst_59 {dimension_numbers = #tpu.dot_dimension_numbers<[1], [0], [0], [1], [0, 0, 1, 1], [], []>} : vector<16x32xf32>, vector<32x32xf32>, vector<16x32xf32> -> vector<16x32xf32>
    %89 = vector.shape_cast %88 : vector<16x32xf32> to vector<2x8x32xf32>
    %c0_60 = arith.constant 0 : index
    %c0_61 = arith.constant 0 : index
    %c0_62 = arith.constant 0 : index
    %90 = vector.load %arg7[%c0_60, %c0_61, %c0_62] : memref<2x8x32xf32, #tpu.memory_space<vmem>>, vector<2x8x32xf32>
    tpu.vector_store %arg7[%c0_60, %c0_61, %c0_62], %89 {strides = array<i32>} : memref<2x8x32xf32, #tpu.memory_space<vmem>>, vector<2x8x32xf32>,
    return
  }
  func.func @transform_0(%arg0: i32) -> (i32, i32, i32) {
    %c0_i32 = arith.constant 0 : i32
    %c0_i32_0 = arith.constant 0 : i32
    %c0_i32_1 = arith.constant 0 : i32
    return %arg0, %c0_i32, %c0_i32_0 : i32, i32, i32
  }
  func.func @transform_1(%arg0: i32) -> (i32, i32, i32) {
    %c0_i32 = arith.constant 0 : i32
    %c0_i32_0 = arith.constant 0 : i32
    %c0_i32_1 = arith.constant 0 : i32
    return %arg0, %c0_i32, %c0_i32_0 : i32, i32, i32
  }
  func.func @transform_2(%arg0: i32) -> (i32, i32) {
    %c0_i32 = arith.constant 0 : i32
    %c0_i32_0 = arith.constant 0 : i32
    %c0_i32_1 = arith.constant 0 : i32
    return %c0_i32, %c0_i32_0 : i32, i32
  }
  func.func @transform_3(%arg0: i32) -> (i32, i32) {
    %c0_i32 = arith.constant 0 : i32
    %c0_i32_0 = arith.constant 0 : i32
    %c0_i32_1 = arith.constant 0 : i32
    return %c0_i32, %c0_i32_0 : i32, i32
  }
  func.func @transform_4(%arg0: i32) -> (i32, i32) {
    %c0_i32 = arith.constant 0 : i32
    %c0_i32_0 = arith.constant 0 : i32
    %c0_i32_1 = arith.constant 0 : i32
    return %c0_i32, %c0_i32_0 : i32, i32
  }
  func.func @transform_5(%arg0: i32) -> (i32, i32) {
    %c0_i32 = arith.constant 0 : i32
    %c0_i32_0 = arith.constant 0 : i32
    %c0_i32_1 = arith.constant 0 : i32
    return %c0_i32, %c0_i32_0 : i32, i32
  }
  func.func @transform_6(%arg0: i32) -> (i32, i32, i32) {
    %c0_i32 = arith.constant 0 : i32
    %c0_i32_0 = arith.constant 0 : i32
    %c0_i32_1 = arith.constant 0 : i32
    return %arg0, %c0_i32, %c0_i32_0 : i32, i32, i32
  }
  func.func @transform_7(%arg0: i32) -> (i32, i32, i32) {
    %c0_i32 = arith.constant 0 : i32
    %c0_i32_0 = arith.constant 0 : i32
    %c0_i32_1 = arith.constant 0 : i32
    return %arg0, %c0_i32, %c0_i32_0 : i32, i32, i32
  }
}

</mosaic_0001>

<bundles_post_ra>
// kernel: tpu_custom_call.1
= control target key start
LH: loop header
LB: loop body
LE: loop exit
PB: predicated region body
PF: predicated region fallthrough
CT: control target
= control target key end

     0   :  { %s3706_s0 = inlined_call_operand.hbm [shape: f32[4,8,32], index: 0, kind: input, shape index: {}]   ;;  %s3707_s1 = inlined_call_operand.hbm [shape: f32[4,8,32], index: 1, kind: input, shape index: {}]   ;;  %s3708_s2 = inlined_call_operand.hbm [shape: f32[32,32], index: 2, kind: input, shape index: {}]   ;;  %s3709_s3 = inlined_call_operand.hbm [shape: f32[32,32], index: 3, kind: input, shape index: {}]   ;;  %s3710_s4 = inlined_call_operand.hbm [shape: f32[32,32], index: 4, kind: input, shape index: {}]   ;;  %s3711_s5 = inlined_call_operand.hbm [shape: f32[32,32], index: 5, kind: input, shape index: {}]   ;;  %s3712_s6 = inlined_call_operand.hbm [shape: f32[4,8,32], index: 6, kind: output, shape index: {0}]   ;;  %s3713_s7 = inlined_call_operand.hbm [shape: f32[4,8,32], index: 7, kind: output, shape index: {1}]  }
   0x1   :  { %3722 = sst [smem:[#allocation25_spill]] %s3706_s0 }
   0x2   :  { %3723 = sst [smem:[#allocation26_spill]] %s3708_s2 }
   0x3   :  { %3724 = sst [smem:[#allocation27_spill]] %s3709_s3 }
   0x4   :  { %13 = vsyncpa [#allocation4], 0 }
   0x5   :  { %15 = vsyncpa [#allocation4 + $0x1], 0 }
   0x6   :  { %16 = vsyncpa [#allocation7], 0 }
   0x7   :  { %18 = vsyncpa [#allocation7 + $0x1], 0 }
   0x8   :  { %19 = vsyncpa [#allocation10], 0 }
   0x9   :  { %20 = vsyncpa [#allocation13], 0 }
   0xa   :  { %21 = vsyncpa [#allocation5], 0 }
   0xb   :  { %23 = vsyncpa [#allocation5 + $0x1], 0 }
   0xc   :  { %24 = vsyncpa [#allocation16], 0 }
   0xd   :  { %26 = vsyncpa [#allocation16 + $0x1], 0  ;;  %s3101_s24 = smov 0   ;;  %s3103_s25 = smov 0  }
   0xe   :  { %s3105_s26 = smov 0   ;;  %s3107_s27 = smov 0  }
   0xf LB: > { %s3122_s28 = sadd.s32 4294967295, %s3040_s27   ;;  %s2336_s29 = sadd.s32 4294967294, %s3040_s27   ;;  %s3040_s27 = sphi %s3107_s27, %s3753_s27   ;;  %s3036_s26 = sphi %s3105_s26, %s3752_s26   ;;  %s3032_s25 = sphi %s3103_s25, %s3751_s25   ;;  %s3028_s24 = sphi %s3101_s24, %s3750_s24  }
  0x10   : > { %p52_p0 = scmp.ne.s32.totalorder %s3032_s25, %s3028_s24  ;;  %p3714_p1 = scmp.eq.s32.totalorder %s3122_s28, 0 }
  0x11   : > { %p192_p3 = scmp.eq.s32.totalorder %s2336_s29, 1  ;;  %p2337_p5 = scmp.ge.s32.totalorder %s3040_s27, 1 }
  0x12   : > { %p3131_p4 = por %p3714_p1, %p52_p0  ;;  %p225_p7 = scmp.lt.s32.totalorder %s3040_s27, 3 }
  0x13   : > { %p3136_p6 = por %p192_p3, %p52_p0  ;;  %s3042_s10 = smov [#allocation8]  }
  0x14   : > { %s3725_s30 = scalar_select %p3131_p4, 1, 0 }
  0x15   : > { %s3726_s8 = scalar_select %p3136_p6, 1, 0 }
  0x16   : > { %p3141_p8 = pnand %p2337_p5, %p225_p7  ;;  %s237_s11 = sshll.u32 %s3042_s10, 4  ;;  %s3145_s11 = int_to_ptr.vmem [resolvable:$true] %s237_s11 }
  0x17   : > { %3727 = sst [smem:[#allocation24_spill]] %s3726_s8  ;;  %s3043_s13 = smov [#allocation9]  }
  0x18   : > { %s3728_s9 = scalar_select %p3141_p8, 1, 0 }
  0x19   : > { %p2638_p9 = pneg %p3141_p8  ;;  %s250_s14 = sshll.u32 %s3043_s13, 4  ;;  %s3156_s14 = int_to_ptr.vmem [resolvable:$true] %s250_s14 }
  0x1a   : > { %s3044_s15 = smov [#allocation11]   ;;  %s3730_s2 = sld [smem:[#allocation26_spill]] }
  0x1b   : > { %p3152_p11 = pnand %p2638_p9, %p3714_p1  ;;  %s3158_s16 = sshll.u32 %s3044_s15, 4  ;;  %s264_s16 = int_to_ptr.vmem [resolvable:$true] %s3158_s16 }
  0x1d   : > { %p3168_p13 = pneg %p3152_p11 }
  0x20   : > { %s2754_s19 = scalar_lea.hbm %s3730_s2, 512 }
  0x21   : > { %p2755_p12 = scmp.ne.s32.totalorder %s3730_s2, %s2754_s19  ;;  %p2761_p5 = scmp.lt.u32.totalorder %s2754_s19, %s3730_s2 }
  0x23   : > { %p2757_p0 = pnand %p3168_p13, %p2755_p12 }
  0x25   : > { %p2758_p3 = pneg %p2757_p0 }
  0x27   : > { %p2763_p7 = pnand %p2761_p5, %p2758_p3 }
  0x29   : > { %2766 = shalt.err (!%p2763_p7)
}
  0x2a   : > { %s2767_s10 = scalar_lea.vmem %s3145_s11, 512  ;;  %p2775_p2 = scmp.lt.s32.totalorder %s3145_s11, %s3145_s11 }
  0x2b   : > { %p2768_p9 = scmp.ne.s32.totalorder %s3145_s11, %s2767_s10  ;;  %p2776_p6 = scmp.lt.s32.totalorder %s2767_s10, %s2767_s10 }
  0x2d   : > { %p2770_p10 = pnand %p2768_p9, %p3168_p13  ;;  %p2777_p12 = por %p2776_p6, %p2775_p2 }
  0x2f   : > { %p2771_p1 = pneg %p2770_p10 }
  0x31   : > { %p2778_p0 = pnand %p2777_p12, %p2771_p1 }
  0x33   : > { %2781 = shalt.err (!%p2778_p0)
}
  0x34   : > { %s3718_s13 = smov 128   ;;  %s3720_s15 = smov 8  }
  0x35   : > { %2641 = dma.hbm_to_vmem [thread:$0]  (!%p3152_p11), %s3730_s2, 512, %s3145_s11, [#allocation7], %s3718_s13, %s3718_s13, %s3720_s15  }
  0x36   : > { %s3732_s3 = sld [smem:[#allocation27_spill]] }
  0x3c   : > { %s2782_s21 = scalar_lea.hbm %s3732_s3, 512 }
  0x3d   : > { %p2783_p1 = scmp.ne.s32.totalorder %s3732_s3, %s2782_s21  ;;  %p2789_p10 = scmp.lt.u32.totalorder %s2782_s21, %s3732_s3 }
  0x3f   : > { %p2785_p2 = pnand %p2783_p1, %p3168_p13 }
  0x41   : > { %p2786_p6 = pneg %p2785_p2 }
  0x43   : > { %p2791_p3 = pnand %p2789_p10, %p2786_p6 }
  0x45   : > { %2794 = shalt.err (!%p2791_p3)
}
  0x46   : > { %s2795_s11 = scalar_lea.vmem %s3156_s14, 512  ;;  %p2803_p12 = scmp.lt.s32.totalorder %s3156_s14, %s3156_s14 }
  0x47   : > { %p2796_p5 = scmp.ne.s32.totalorder %s3156_s14, %s2795_s11  ;;  %p2804_p0 = scmp.lt.s32.totalorder %s2795_s11, %s2795_s11 }
  0x49   : > { %p2798_p7 = pnand %p2796_p5, %p3168_p13  ;;  %p2805_p1 = por %p2804_p0, %p2803_p12 }
  0x4b   : > { %p2799_p9 = pneg %p2798_p7 }
  0x4d   : > { %p2806_p2 = pnand %p2805_p1, %p2799_p9 }
  0x4f   : > { %2809 = shalt.err (!%p2806_p2)
}
  0x50   : > { %2644 = dma.hbm_to_vmem [thread:$0]  (!%p3152_p11), %s3732_s3, 512, %s3156_s14, [#allocation10], %s3718_s13, %s3718_s13, %s3720_s15  }
  0x51   : > { %s2810_s20 = scalar_lea.hbm %s3710_s4, 512 }
  0x52   : > { %p2811_p6 = scmp.ne.s32.totalorder %s3710_s4, %s2810_s20  ;;  %p2817_p5 = scmp.lt.u32.totalorder %s2810_s20, %s3710_s4 }
  0x54   : > { %p2813_p10 = pnand %p2811_p6, %p3168_p13 }
  0x56   : > { %p2814_p3 = pneg %p2813_p10 }
  0x58   : > { %p2819_p7 = pnand %p2817_p5, %p2814_p3 }
  0x5a   : > { %2822 = shalt.err (!%p2819_p7)
}
  0x5b   : > { %s2823_s11 = scalar_lea.vmem %s264_s16, 512  ;;  %p2831_p1 = scmp.lt.s32.totalorder %s264_s16, %s264_s16 }
  0x5c   : > { %p2824_p9 = scmp.ne.s32.totalorder %s264_s16, %s2823_s11  ;;  %p2832_p2 = scmp.lt.s32.totalorder %s2823_s11, %s2823_s11 }
  0x5e   : > { %p2826_p12 = pnand %p2824_p9, %p3168_p13  ;;  %p2833_p4 = por %p2832_p2, %p2831_p1 }
  0x60   : > { %p2827_p0 = pneg %p2826_p12 }
  0x62   : > { %p2834_p8 = pnand %p2833_p4, %p2827_p0 }
  0x64   : > { %2837 = shalt.err (!%p2834_p8)
}
  0x65   : > { %2647 = dma.hbm_to_vmem [thread:$0]  (!%p3152_p11), %s3710_s4, 512, %s264_s16, [#allocation10], %s3718_s13, %s3718_s13, %s3720_s15  }
  0x66   : > { %s3047_s17 = smov [#allocation12]   ;;  %s2838_s21 = scalar_lea.hbm %s3711_s5, 512 }
  0x67   : > { %s276_s18 = sshll.u32 %s3047_s17, 4  ;;  %p2839_p4 = scmp.ne.s32.totalorder %s3711_s5, %s2838_s21  ;;  %s277_s18 = int_to_ptr.vmem [resolvable:$true] %s276_s18 }
  0x68   : > { %p2845_p10 = scmp.lt.u32.totalorder %s2838_s21, %s3711_s5 }
  0x69   : > { %p2841_p8 = pnand %p2839_p4, %p3168_p13 }
  0x6b   : > { %p2842_p6 = pneg %p2841_p8 }
  0x6d   : > { %p2847_p3 = pnand %p2845_p10, %p2842_p6 }
  0x6f   : > { %2850 = shalt.err (!%p2847_p3)
}
  0x70   : > { %s2851_s16 = scalar_lea.vmem %s277_s18, 512  ;;  %p2859_p12 = scmp.lt.s32.totalorder %s277_s18, %s277_s18 }
  0x71   : > { %p2852_p5 = scmp.ne.s32.totalorder %s277_s18, %s2851_s16  ;;  %p2860_p0 = scmp.lt.s32.totalorder %s2851_s16, %s2851_s16 }
  0x73   : > { %p2854_p7 = pnand %p2852_p5, %p3168_p13  ;;  %p2861_p1 = por %p2860_p0, %p2859_p12 }
  0x75   : > { %p2855_p9 = pneg %p2854_p7 }
  0x77   : > { %p2862_p2 = pnand %p2861_p1, %p2855_p9 }
  0x79   : > { %2865 = shalt.err (!%p2862_p2)
}
  0x7a   : > { %2650 = dma.hbm_to_vmem [thread:$0]  (!%p3152_p11), %s3711_s5, 512, %s277_s18, [#allocation13], %s3718_s13, %s3718_s13, %s3720_s15  }
  0x7b   : > { %s3262_s22 = sadd.s32 1, %s3040_s27   ;;  %s39_s12 = sadd.s32 1, %s3036_s26 }
  0x7c   : > { %s36_s17 = ssub.s32 %s3040_s27, %s3262_s22  ;;  %p46_p13 = scmp.ne.s32.totalorder %s3036_s26, %s3032_s25 }
  0x7d   : > { %p37_p4 = scmp.eq.s32.totalorder %s36_s17, 0  ;;  %p47_p8 = scmp.eq.s32.totalorder %s3040_s27, 0 }
  0x7e   : > { %p3733_p6 = scmp.eq.s32.totalorder %s3122_s28, 1  ;;  %p2669_p3 = scmp.lt.s32.totalorder %s3040_s27, 2 }
  0x7f   : > { %s3278_s20 = scalar_select %p37_p4, %s3036_s26, %s39_s12  }
  0x80   : > { %p3272_p10 = por %p3733_p6, %p46_p13  ;;  %p48_p5 = por %p47_p8, %p46_p13 }
  0x81   : > { %s290_s21 = sand.u32 1, %s3036_s26   ;;  %s2398_s18 = sshll.u32 %s3040_s27, 8 }
  0x82   : > { %s2343_s23 = sshll.u32 %s290_s21, 4  ;;  %s3735_s0 = sld [smem:[#allocation25_spill]] }
  0x83   : > { %s294_s16 = scalar_lea.vmem [#allocation3], %s2343_s23  ;;  %p3289_p11 = pnand %p2669_p3, %p48_p5 }
  0x84   : > { %s301_s14 = sshll.u32 %s294_s16, 4  ;;  %s3296_s29 = scalar_lea.hbm %s3707_s1, %s2398_s18  ;;  %s3287_s14 = int_to_ptr.vmem [resolvable:$true] %s301_s14 }
  0x85   : > { %s315_s10 = scalar_lea.vmem [#allocation6], %s2343_s23  ;;  %s3300_s15 = scalar_lea.sflag [#allocation4], %s290_s21 }
  0x86   : > { %s3298_s13 = sshll.u32 %s315_s10, 4  ;;  %p2868_p9 = pneg %p3289_p11  ;;  %s3332_s13 = int_to_ptr.vmem [resolvable:$true] %s3298_s13 }
  0x88   : > { %s3285_s11 = scalar_lea.hbm %s3735_s0, %s2398_s18  ;;  %s2871_s12 = scalar_lea.hbm %s3735_s0, 512 }
  0x89   : > { %s2866_s16 = scalar_lea.hbm %s3285_s11, 256  ;;  %p2872_p1 = scmp.lt.u32.totalorder %s3285_s11, %s3735_s0 }
  0x8a   : > { %p2867_p7 = scmp.ne.s32.totalorder %s3285_s11, %s2866_s16  ;;  %p2873_p2 = scmp.lt.u32.totalorder %s2871_s12, %s2866_s16 }
  0x8b   : > { %p2875_p4 = scmp.lt.u32.totalorder %s2866_s16, %s3285_s11 }
  0x8c   : > { %p2869_p12 = pnand %p2868_p9, %p2867_p7  ;;  %p2874_p13 = por %p2873_p2, %p2872_p1 }
  0x8e   : > { %p2870_p0 = pneg %p2869_p12  ;;  %p2876_p8 = por %p2875_p4, %p2874_p13 }
  0x90   : > { %p2877_p6 = pnand %p2876_p8, %p2870_p0 }
  0x92   : > { %2880 = shalt.err (!%p2877_p6)
}
  0x93   : > { %s2881_s21 = scalar_lea.vmem %s3287_s14, 256  ;;  %s3048_s2 = smov [#allocation3]  }
  0x94   : > { %p2882_p3 = scmp.ne.s32.totalorder %s3287_s14, %s2881_s21  ;;  %s2886_s3 = sshll.u32 %s3048_s2, 4  ;;  %s2887_s3 = int_to_ptr.vmem [resolvable:$false] %s2886_s3 }
  0x95   : > { %s2888_s23 = scalar_lea.vmem %s2887_s3, 512  ;;  %p2889_p12 = scmp.lt.s32.totalorder %s3287_s14, %s2887_s3 }
  0x96   : > { %p2884_p5 = pnand %p2882_p3, %p2868_p9  ;;  %p2890_p1 = scmp.lt.s32.totalorder %s2888_s23, %s2881_s21 }
  0x98   : > { %p2885_p7 = pneg %p2884_p5  ;;  %p2891_p2 = por %p2890_p1, %p2889_p12 }
  0x9a   : > { %p2892_p13 = pnand %p2891_p2, %p2885_p7 }
  0x9c   : > { %2895 = shalt.err (!%p2892_p13)
}
  0x9d   : > { %s3737_s10 = smov 8   ;;  %s3738_s16 = smov 128  }
  0x9e   : > { %2654 = dma.hbm_to_vmem [thread:$0]  (!%p3289_p11), %s3285_s11, 256, %s3287_s14, %s3300_s15, %s3738_s16, %s3738_s16, %s3737_s10  }
  0x9f   : > { %s311_s12 = sand.u32 1, %s3040_s27   ;;  %s2896_s18 = scalar_lea.hbm %s3296_s29, 256 }
  0xa0   : > { %s3335_s17 = scalar_lea.sflag [#allocation7], %s311_s12  ;;  %p2897_p0 = scmp.ne.s32.totalorder %s3296_s29, %s2896_s18 }
  0xa1   : > { %s2901_s3 = scalar_lea.hbm %s3707_s1, 512  ;;  %p2902_p6 = scmp.lt.u32.totalorder %s3296_s29, %s3707_s1 }
  0xa2   : > { %p2899_p4 = pnand %p2897_p0, %p2868_p9  ;;  %p2903_p3 = scmp.lt.u32.totalorder %s2901_s3, %s2896_s18 }
  0xa3   : > { %p2905_p7 = scmp.lt.u32.totalorder %s2896_s18, %s3296_s29 }
  0xa4   : > { %p2900_p8 = pneg %p2899_p4  ;;  %p2904_p5 = por %p2903_p3, %p2902_p6 }
  0xa6   : > { %p2906_p12 = por %p2905_p7, %p2904_p5 }
  0xa8   : > { %p2907_p1 = pnand %p2906_p12, %p2900_p8 }
  0xaa   : > { %2910 = shalt.err (!%p2907_p1)
}
  0xab   : > { %s2911_s15 = scalar_lea.vmem %s3332_s13, 256  ;;  %s3049_s11 = smov [#allocation6]  }
  0xac   : > { %p2912_p2 = scmp.ne.s32.totalorder %s3332_s13, %s2911_s15  ;;  %s2916_s14 = sshll.u32 %s3049_s11, 4  ;;  %s2917_s14 = int_to_ptr.vmem [resolvable:$false] %s2916_s14 }
  0xad   : > { %s2918_s0 = scalar_lea.vmem %s2917_s14, 512  ;;  %p2919_p4 = scmp.lt.s32.totalorder %s3332_s13, %s2917_s14 }
  0xae   : > { %p2914_p13 = pnand %p2912_p2, %p2868_p9  ;;  %p2920_p6 = scmp.lt.s32.totalorder %s2918_s0, %s2911_s15 }
  0xb0   : > { %p2915_p0 = pneg %p2914_p13  ;;  %p2921_p3 = por %p2920_p6, %p2919_p4 }
  0xb2   : > { %p2922_p5 = pnand %p2921_p3, %p2915_p0 }
  0xb4   : > { %2925 = shalt.err (!%p2922_p5)
}
  0xb5   : > { %2657 = dma.hbm_to_vmem [thread:$0]  (!%p3289_p11), %s3296_s29, 256, %s3332_s13, %s3335_s17, %s3738_s16, %s3738_s16, %s3737_s10  }
  0xb6   : > { %p3739_p9 = scmp.ne.s32.totalorder %s3728_s9, 0 }
  0xb7   : > { %s3367_s12 = sand.u32 (!%p3739_p9), 1, %s3032_s25   ;;  %p3740_p8 = scmp.ne.s32.totalorder (!%p3739_p9), %s3725_s30, 0 }
  0xb8   : > { %334 = sbr.rel (%p3739_p9) target bundleno = 3166 (0xc5e), region = 44  ;;  %s3370_s18 = sshll.u32 (!%p3739_p9), %s3367_s12, 4 }
  0xb9   : > { %s337_s8 = scalar_lea.sflag (!%p3739_p9), [#allocation4], %s3367_s12  ;;  %s340_s21 = scalar_lea.vmem (!%p3739_p9), [#allocation3], %s3370_s18 }
  0xbf   : > { %2999 = dma.done.wait (%p3740_p8), %s337_s8, 256  }
  0xc0   : > { %3001 = vsyncadd (%p3740_p8), %s337_s8, 4294967040  ;;  %s345_s9 = sand.u32 1, %s3122_s28   ;;  %s349_s29 = scalar_lea.vmem [#allocation6], %s3370_s18 }
  0xc1   : > { %s346_s13 = scalar_lea.sflag [#allocation7], %s345_s9 }
  0xc2   : > { %3003 = dma.done.wait (%p3740_p8), %s346_s13, 256  }
  0xc3   : > { %3005 = vsyncadd (%p3740_p8), %s346_s13, 4294967040  ;;  %p3741_p11 = scmp.eq.s32.totalorder %s3122_s28, 0 }
  0xc5   : > { %3007 = dma.done.wait (%p3741_p11), [#allocation7], 512   ;;  %p3742_p7 = pmov %p3741_p11 }
  0xc7   : > { %3009 = vsyncadd (%p3742_p7), [#allocation7], 4294966784  ;;  %p3743_p12 = pmov %p3742_p7 }
  0xc8   : > { %p3744_p1 = pmov %p3742_p7 }
  0xc9   : > { %3011 = dma.done.wait (%p3743_p12), [#allocation10], 1024  }
  0xca   : > { %3013 = vsyncadd (%p3744_p1), [#allocation10], 4294966272  ;;  %p3745_p2 = pmov %p3744_p1 }
  0xcb   : > { %p3746_p13 = pmov %p3744_p1 }
  0xcc   : > { %3015 = dma.done.wait (%p3745_p2), [#allocation13], 512  }
  0xcd   : > { %3017 = vsyncadd (%p3746_p13), [#allocation13], 4294966784  ;;  %v418_v0 = vld [vmem:[#allocation9] sm:$0xff]  ;;  %v419_v1 = vld [vmem:[#allocation9 + $0x8] sm:$0xff]  ;;  %vm430_vm0 = vcmask 261120   ;;  %v3050_v16 = vmov 0.0  }
  0xce   : > { %v414_v2 = vld [vmem:[#allocation8] sm:$0xff]  ;;  %v2590_v3 = vpack.c.bf16 %v419_v1, %v418_v0  ;;  %v415_v4 = vld [vmem:[#allocation8 + $0x8] sm:$0xff]  ;;  %v420_v5 = vld [vmem:[#allocation9 + $0x10] sm:$0xff]  ;;  %vm3051_vm1 = vmmov 0   ;;  %vm668_vm2 = vcmask 64512   ;;  %s3052_s30 = smov 120  }
  0xcf   : > { %v421_v6 = vld [vmem:[#allocation9 + $0x18] sm:$0xff]  ;;  %v2582_v7 = vpack.c.bf16 %v415_v4, %v414_v2  ;;  %v416_v9 = vld [vmem:[#allocation8 + $0x10] sm:$0xff]  ;;  %v422_v21 = vld [vmem:[#allocation11] sm:$0xff]  ;;  %s3463_s10 = scalar_lea.vmem [#allocation15], %s3370_s18  ;;  %s3053_s16 = smov 112   ;;  %vm1183_vm3 = vcmask 130112  }
  0xd0   : > { %v2594_v8 = vpack.c.bf16 %v421_v6, %v420_v5  ;;  %v417_v10 = vld [vmem:[#allocation8 + $0x18] sm:$0xff]  ;;  %v412_v11 = vld [vmem:[%s349_s29] sm:$0xff]  ;;  %2591 = vmatprep.subr.bf16.mxu1 %v2590_v3  ;;  %v423_v22 = vld [vmem:[#allocation11 + $0x8] sm:$0xff]  ;;  %s3054_s17 = smov 104   ;;  %s3055_s2 = smov 8   ;;  %vm1536_vm4 = vcmask 195712  }
  0xd1   : > { %v2586_v12 = vpack.c.bf16 %v417_v10, %v416_v9  ;;  %2477 = vmatprep.mubr.msk.f32.mxu1 %vm430_vm0, %v412_v11  ;;  %v410_v13 = vld [vmem:[%s340_s21] sm:$0xff]  ;;  %2593 = vmatpush3.bf16.msra.mxu1 %v2590_v3  ;;  %v413_v14 = vld [vmem:[%s349_s29 + $0x8] sm:$0xff]  ;;  %v2598_v24 = vpack.c.bf16 %v423_v22, %v422_v21  ;;  %s3056_s3 = smov 16   ;;  %s3057_s23 = smov 24   ;;  %vm1887_vm5 = vcmask 261312  }
  0xd2   : > { %2583 = vmatprep.subr.bf16.mxu0 %v2582_v7  ;;  %2595 = vmatprep.subr.bf16.mxu1 %v2594_v8  ;;  %v411_v15 = vld [vmem:[%s340_s21 + $0x8] sm:$0xff]  ;;  %v424_v23 = vld [vmem:[#allocation11 + $0x10] sm:$0xff]  ;;  %s2400_s15 = sshll.u32 %s3122_s28, 8  ;;  %s2170_s8 = sshll.u32 %s3463_s10, 4  ;;  %s3620_s8 = int_to_ptr.vmem [resolvable:$true] %s2170_s8 }
  0xd3   : > { %2585 = vmatpush3.bf16.msra.mxu0 %v2582_v7  ;;  %2466 = vmatprep.mubr.msk.f32.mxu0 %vm430_vm0, %v410_v13  ;;  %v425_v25 = vld [vmem:[#allocation11 + $0x18] sm:$0xff]  ;;  %s3617_s0 = scalar_lea.hbm %s3713_s7, %s2400_s15  ;;  %s2141_s21 = scalar_lea.sflag [#allocation16], %s3367_s12 }
  0xd4   : > { %2587 = vmatprep.subr.bf16.mxu0 %v2586_v12  ;;  %v2602_v26 = vpack.c.bf16 %v425_v25, %v424_v23  ;;  %s2926_s9 = scalar_lea.vmem %s3620_s8, 256  ;;  %s3058_s13 = smov [#allocation15]  }
  0xd5   : > { %2597 = vmatpush3.bf16.msra.mxu1 %v2594_v8  ;;  %p2927_p0 = scmp.ne.s32.totalorder %s3620_s8, %s2926_s9  ;;  %s2930_s29 = sshll.u32 %s3058_s13, 4  ;;  %s2931_s29 = int_to_ptr.vmem [resolvable:$false] %s2930_s29 }
  0xd6   : > { %2491 = vmatprep.subr.mxu1 %v3050_v16  ;;  %p2933_p3 = scmp.lt.s32.totalorder %s3620_s8, %s2931_s29 }
  0xd7   : > { %2589 = vmatpush3.bf16.msra.mxu0 %v2586_v12  ;;  %p2928_p4 = pnand %p2927_p0, %p3272_p10 }
  0xd8   : > { %2478 = vmatmul.mubr.msk.f32.vlgmr.msra.gmra.mrb[0].mxu1 %vm430_vm0, %v413_v14  ;;  %2599 = vmatprep.subr.bf16.mxu0 %v2598_v24 }
  0xd9   : > { %2493 = vmatprep.mubr.msk.f32.mxu1 %vm3051_vm1, %v3050_v16  ;;  %p2929_p6 = pneg %p2928_p4 }
  0xda   : > { %2467 = vmatmul.mubr.msk.f32.vlgmr.msra.gmra.mrb[0].mxu0 %vm430_vm0, %v411_v15 }
  0xdb   : > { %2488 = vmatprep.mubr.msk.f32.mxu0 %vm430_vm0, %v412_v11  ;;  %2601 = vmatpush3.bf16.msra.mxu0 %v2598_v24 }
  0xdc   : > { %2603 = vmatprep.subr.bf16.mxu0 %v2602_v26 }
  0xdf   : > { %2605 = vmatpush3.bf16.msra.mxu0 %v2602_v26 }
  0xe0   : > { %2511 = vmatprep.subr.mxu0 %v3050_v16 }
  0xe2   : > { %2489 = vmatmul.mubr.msk.f32.vlgmr.msra.gmra.mrb[2].mxu0 %vm430_vm0, %v413_v14 }
  0xe3   : > { %2513 = vmatprep.mubr.msk.f32.mxu0 %vm3051_vm1, %v3050_v16 }
 0x1ab   : > { %v3412_v17 = vpop.f32.mrb[0].mxu1 }
 0x1ac   : > { %1075 = vrot.lane.b32.xlu1 %v3412_v17, %s3052_s30  ;;  %v3416_v18 = vpop.f32.mrb[1].mxu1 }
 0x1ad   : > { %v3418_v19 = vpop.f32.mrb[0].mxu0  ;;  %2492 = vmatpush3.xpose.msk.msra.mxu1 %vm668_vm2, %v3416_v18 }
 0x1ae   : > { %v3422_v20 = vpop.f32.mrb[1].mxu0  ;;  %2496 = vmatprep.subr.mxu1 %v3050_v16 }
 0x1b0   : > { %995 = vrot.lane.b32.xlu1 %v3422_v20, %s3052_s30  ;;  %2494 = vmatmul.mubr.msk.f32.vlgmr.msra.gmra.mrb[2].mxu1 %vm668_vm2, %v3422_v20 }
 0x1b1   : > { %2497 = vmatpush3.xpose.msk.msra.mxu1 %vm668_vm2, %v3412_v17  ;;  %2498 = vmatprep.mubr.msk.f32.mxu1 %vm3051_vm1, %v3050_v16 }
 0x1b2   : > { %2501 = vmatprep.subr.mxu1 %v3050_v16 }
 0x1b4   : > { %2499 = vmatmul.mubr.msk.f32.vlgmr.msra.gmra.mrb[4].mxu1 %vm668_vm2, %v3418_v19 }
 0x1b5   : > { %2503 = vmatprep.mubr.msk.f32.mxu1 %vm3051_vm1, %v3050_v16  ;;  %v3455_v48 = vpop.f32.mrb[2].mxu0 }
 0x1b6   : > { %v3457_v49 = vpop.f32.mrb[3].mxu0 }
 0x1b7   : > { %2502 = vmatpush3.msra.mxu1 %v3457_v49 }
 0x1b8   : > { %2506 = vmatprep.subr.mxu1 %v3050_v16 }
 0x21e   : > { %v1076_v39 = vpop.permute.xlu1 %1075 }
 0x222   : > { %v996_v43 = vpop.permute.xlu1 %995 }
 0x283   : > { %v741_v27 = vpop.f32.mrb[2].mxu1 }
 0x284   : > { %v821_v28 = vmul.f32 0.35355338, %v741_v27  ;;  %v2495_v29 = vpop.f32.mrb[3].mxu1 }
 0x286   : > { %v823_v30 = vsel %vm668_vm2, %v821_v28, -inf }
 0x287   : > { %824 = vmax.xlane.f32.xlu0 %v823_v30  ;;  %v817_v31 = vpop.f32.mrb[4].mxu1 }
 0x288   : > { %v822_v32 = vmul.f32 0.35355338, %v817_v31  ;;  %v2500_v33 = vpop.f32.mrb[5].mxu1 }
 0x28a   : > { %v826_v34 = vsel %vm668_vm2, %v822_v32, -inf }
 0x28b   : > { %827 = vmax.xlane.f32.xlu0 %v826_v34 }
 0x2a1   : > { %997 = vrot.lane.b32.xlu0 %v3416_v18, %s3052_s30 }
 0x314   : > { %v825_v35 = vpop.xlane.xlu0 %824 }
 0x315   : > { %v829_v36 = vsub.f32 %v821_v28, %v825_v35 }
 0x317   : > { %v831_v37 = vmul.f32 1.442695, %v829_v36 }
 0x318   : > { %v828_v38 = vpop.xlane.xlu0 %827 }
 0x319   : > { %2722 = vpow2.f32 %v831_v37  ;;  %v830_v40 = vsub.f32 %v822_v32, %v828_v38 }
 0x31b   : > { %v833_v41 = vmul.f32 1.442695, %v830_v40 }
 0x31c   : > { %v998_v42 = vpop.permute.xlu0 %997 }
 0x31d   : > { %2724 = vpow2.f32 %v833_v41  ;;  %2512 = vmatpush3.xpose.msk.msra.mxu0 %vm668_vm2, %v998_v42 }
 0x31e   : > { %2521 = vmatprep.subr.mxu0 %v3050_v16 }
 0x320   : > { %2514 = vmatmul.mubr.msk.f32.vlgmr.msra.gmra.mrb[4].mxu0 %vm668_vm2, %v996_v43 }
 0x321   : > { %2523 = vmatprep.mubr.msk.f32.mxu0 %vm3051_vm1, %v3050_v16 }
 0x323   : > { %v2723_v44 = vpop.eup %2722 }
 0x324   : > { %v835_v45 = vsel %vm668_vm2, %v2723_v44, 0.0 }
 0x325   : > { %836 = vadd.xlane.f32.xlu1 %v835_v45 }
 0x327   : > { %v2725_v46 = vpop.eup %2724 }
 0x328   : > { %v838_v47 = vsel %vm668_vm2, %v2725_v46, 0.0 }
 0x329   : > { %839 = vadd.xlane.f32.xlu1 %v838_v47 }
 0x33a   : > { %1073 = vrot.lane.b32.xlu1 %v3418_v19, %s3052_s30 }
 0x3b2   : > { %v837_v50 = vpop.xlane.xlu1 %836 }
 0x3b3   : > { %2726 = vrcp.f32 %v837_v50 }
 0x3b6   : > { %v840_v51 = vpop.xlane.xlu1 %839 }
 0x3b7   : > { %2728 = vrcp.f32 %v840_v51 }
 0x3ba   : > { %v1074_v56 = vpop.permute.xlu1 %1073 }
 0x3bd   : > { %v2727_v52 = vpop.eup %2726 }
 0x3be   : > { %v842_v53 = vmul.f32 %v2727_v52, %v2723_v44 }
 0x3c0   : > { %2504 = vmatmul.mubr.msk.f32.vlgmr.msra.gmra.mrb[6].mxu1 %vm668_vm2, %v842_v53  ;;  %845 = vst.msk [vmem:[%s3463_s10] sm:$0xff] %vm668_vm2, %v842_v53 }
 0x3c1   : > { %v2729_v54 = vpop.eup %2728  ;;  %2507 = vmatpush3.msra.mxu1 %v3455_v48  ;;  %2508 = vmatprep.mubr.msk.f32.mxu1 %vm3051_vm1, %v3050_v16 }
 0x3c2   : > { %v844_v55 = vmul.f32 %v2729_v54, %v2725_v46  ;;  %2516 = vmatprep.subr.mxu1 %v3050_v16 }
 0x3c4   : > { %2509 = vmatmul.mubr.msk.f32.vlgmr.msra.gmra.mrb[8].mxu1 %vm668_vm2, %v844_v55  ;;  %846 = vst.msk [vmem:[%s3463_s10 + $0x8] sm:$0xff] %vm668_vm2, %v844_v55 }
 0x3c5   : > { %2518 = vmatprep.mubr.msk.f32.mxu1 %vm3051_vm1, %v3050_v16 }
 0x3c8   : > { %2517 = vmatpush3.xpose.msk.msra.mxu1 %vm668_vm2, %v1076_v39 }
 0x3c9   : > { %2526 = vmatprep.subr.mxu1 %v3050_v16 }
 0x3cb   : > { %2519 = vmatmul.mubr.msk.f32.vlgmr.msra.gmra.mrb[10].mxu1 %vm668_vm2, %v1074_v56 }
 0x3cc   : > { %2528 = vmatprep.mubr.msk.f32.mxu1 %vm3051_vm1, %v3050_v16 }
 0x3f3   : > { %v1069_v57 = vpop.f32.mrb[4].mxu0 }
 0x3f4   : > { %v1151_v58 = vmul.f32 0.35355338, %v1069_v57  ;;  %v2515_v59 = vpop.f32.mrb[5].mxu0 }
 0x3f6   : > { %v1153_v60 = vsel %vm668_vm2, %v1151_v58, -inf }
 0x3f7   : > { %1154 = vmax.xlane.f32.xlu0 %v1153_v60 }
 0x484   : > { %v1155_v61 = vpop.xlane.xlu0 %1154 }
 0x485   : > { %v1159_v62 = vsub.f32 %v1151_v58, %v1155_v61 }
 0x487   : > { %v1161_v63 = vmul.f32 1.442695, %v1159_v62 }
 0x489   : > { %2730 = vpow2.f32 %v1161_v63 }
 0x493   : > { %v2731_v0 = vpop.eup %2730  ;;  %v916_v1 = vpop.f32.mrb[6].mxu1 }
 0x494   : > { %993 = vst.msk [vmem:[#allocation2] sm:$0xff] %vm668_vm2, %v916_v1  ;;  %v2505_v2 = vpop.f32.mrb[7].mxu1  ;;  %v1165_v3 = vsel %vm668_vm2, %v2731_v0, 0.0 }
 0x495   : > { %1166 = vadd.xlane.f32.xlu0 %v1165_v3 }
 0x497   : > { %v989_v4 = vpop.f32.mrb[8].mxu1 }
 0x498   : > { %994 = vst.msk [vmem:[#allocation2 + $0x8] sm:$0xff] %vm668_vm2, %v989_v4  ;;  %v2510_v5 = vpop.f32.mrb[9].mxu1 }
 0x49e   : > { %v1147_v6 = vpop.f32.mrb[10].mxu1 }
 0x49f   : > { %v1152_v7 = vmul.f32 0.35355338, %v1147_v6  ;;  %v2520_v8 = vpop.f32.mrb[11].mxu1 }
 0x4a1   : > { %v1156_v9 = vsel %vm668_vm2, %v1152_v7, -inf }
 0x4a2   : > { %1157 = vmax.xlane.f32.xlu1 %v1156_v9 }
 0x4ab   : > { %1187 = vrot.lane.b32.xlu0 %v3457_v49, %s3052_s30 }
 0x4b3   : > { %1263 = vrot.lane.b32.xlu1 %v3455_v48, %s3052_s30  ;;  %s2932_s30 = scalar_lea.vmem %s2931_s29, 512 }
 0x4b4   : > { %p2934_p5 = scmp.lt.s32.totalorder %s2932_s30, %s2926_s9 }
 0x4b6   : > { %p2935_p9 = por %p2934_p5, %p2933_p3 }
 0x4b7   : > { %1350 = vrot.lane.b32.xlu1 %v3416_v18, %s3053_s16 }
 0x4b8   : > { %p2936_p8 = pnand %p2935_p9, %p2929_p6 }
 0x4bb   : > { %1428 = vrot.lane.b32.xlu1 %v3412_v17, %s3053_s16 }
 0x4bf   : > { %1426 = vrot.lane.b32.xlu1 %v3418_v19, %s3053_s16 }
 0x522   : > { %v1167_v10 = vpop.xlane.xlu0 %1166 }
 0x523   : > { %2732 = vrcp.f32 %v1167_v10 }
 0x526   : > { %v1188_v11 = vpop.permute.xlu0 %1187 }
 0x527   : > { %2522 = vmatpush3.msra.mxu0 %v1188_v11 }
 0x528   : > { %2531 = vmatprep.subr.mxu0 %v3050_v16 }
 0x52d   : > { %v2733_v12 = vpop.eup %2732 }
 0x52e   : > { %v3497_v13 = vmul.f32 %v2733_v12, %v2731_v0 }
 0x52f   : > { %v1158_v14 = vpop.xlane.xlu1 %1157 }
 0x530   : > { %v1160_v15 = vsub.f32 %v1152_v7, %v1158_v14  ;;  %2524 = vmatmul.mubr.msk.f32.vlgmr.msra.gmra.mrb[6].mxu0 %vm668_vm2, %v3497_v13 }
 0x531   : > { %2533 = vmatprep.mubr.msk.f32.mxu0 %vm3051_vm1, %v3050_v16 }
 0x532   : > { %v1163_v21 = vmul.f32 1.442695, %v1160_v15 }
 0x533   : > { %v1264_v22 = vpop.permute.xlu1 %1263 }
 0x534   : > { %2734 = vpow2.f32 %v1163_v21  ;;  %2527 = vmatpush3.msra.mxu1 %v1264_v22 }
 0x535   : > { %2536 = vmatprep.subr.mxu1 %v3050_v16 }
 0x537   : > { %v1351_v23 = vpop.permute.xlu1 %1350 }
 0x538   : > { %2532 = vmatpush3.xpose.msk.msra.mxu0 %vm668_vm2, %v1351_v23 }
 0x539   : > { %2541 = vmatprep.subr.mxu0 %v3050_v16 }
 0x53b   : > { %v1429_v29 = vpop.permute.xlu1 %1428 }
 0x53e   : > { %v2735_v24 = vpop.eup %2734 }
 0x53f   : > { %v1168_v25 = vsel %vm668_vm2, %v2735_v24, 0.0  ;;  %v1427_v31 = vpop.permute.xlu1 %1426 }
 0x540   : > { %1169 = vadd.xlane.f32.xlu0 %v1168_v25 }
 0x556   : > { %1348 = vrot.lane.b32.xlu0 %v3422_v20, %s3053_s16 }
 0x5cd   : > { %v1170_v26 = vpop.xlane.xlu0 %1169 }
 0x5ce   : > { %2736 = vrcp.f32 %v1170_v26 }
 0x5d1   : > { %v1349_v27 = vpop.permute.xlu0 %1348 }
 0x5d2   : > { %2534 = vmatmul.mubr.msk.f32.vlgmr.msra.gmra.mrb[8].mxu0 %vm668_vm2, %v1349_v27 }
 0x5d3   : > { %2543 = vmatprep.mubr.msk.f32.mxu0 %vm3051_vm1, %v3050_v16 }
 0x5d8   : > { %v2737_v28 = vpop.eup %2736 }
 0x5d9   : > { %v3512_v30 = vmul.f32 %v2737_v28, %v2735_v24 }
 0x5db   : > { %2529 = vmatmul.mubr.msk.f32.vlgmr.msra.gmra.mrb[12].mxu1 %vm668_vm2, %v3512_v30 }
 0x5dc   : > { %2537 = vmatpush3.xpose.msk.msra.mxu1 %vm668_vm2, %v1429_v29  ;;  %2538 = vmatprep.mubr.msk.f32.mxu1 %vm3051_vm1, %v3050_v16 }
 0x5dd   : > { %2546 = vmatprep.subr.mxu1 %v3050_v16 }
 0x5df   : > { %2539 = vmatmul.mubr.msk.f32.vlgmr.msra.gmra.mrb[14].mxu1 %vm668_vm2, %v1427_v31 }
 0x5e0   : > { %2548 = vmatprep.mubr.msk.f32.mxu1 %vm3051_vm1, %v3050_v16 }
 0x603   : > { %v3523_v32 = vpop.f32.mrb[6].mxu0 }
 0x604   : > { %v2525_v33 = vpop.f32.mrb[7].mxu0 }
 0x6a5   : > { %v1422_v34 = vpop.f32.mrb[8].mxu0 }
 0x6a6   : > { %v1504_v35 = vmul.f32 0.35355338, %v1422_v34  ;;  %v2535_v36 = vpop.f32.mrb[9].mxu0 }
 0x6a8   : > { %v1506_v37 = vsel %vm668_vm2, %v1504_v35, -inf }
 0x6a9   : > { %1507 = vmax.xlane.f32.xlu0 %v1506_v37 }
 0x6ae   : > { %v3526_v38 = vpop.f32.mrb[12].mxu1 }
 0x6af   : > { %v2530_v39 = vpop.f32.mrb[13].mxu1 }
 0x6b0   : > { %v427_v39 = vld [vmem:[#allocation12 + $0x8] sm:$0xff] }
 0x6b2   : > { %v1500_v40 = vpop.f32.mrb[14].mxu1 }
 0x6b3   : > { %v1505_v41 = vmul.f32 0.35355338, %v1500_v40  ;;  %v2540_v42 = vpop.f32.mrb[15].mxu1 }
 0x6b4   : > { %v429_v42 = vld [vmem:[#allocation12 + $0x18] sm:$0xff] }
 0x6b5   : > { %v1509_v43 = vsel %vm668_vm2, %v1505_v41, -inf }
 0x6b6   : > { %1510 = vmax.xlane.f32.xlu1 %v1509_v43 }
 0x6c7   : > { %1614 = vrot.lane.b32.xlu1 %v3455_v48, %s3053_s16 }
 0x6cb   : > { %1701 = vrot.lane.b32.xlu1 %v3416_v18, %s3054_s17 }
 0x6cf   : > { %1779 = vrot.lane.b32.xlu1 %v3412_v17, %s3054_s17 }
 0x6d3   : > { %1777 = vrot.lane.b32.xlu1 %v3418_v19, %s3054_s17 }
 0x736   : > { %v1508_v44 = vpop.xlane.xlu0 %1507 }
 0x737   : > { %v1512_v45 = vsub.f32 %v1504_v35, %v1508_v44 }
 0x739   : > { %v1514_v46 = vmul.f32 1.442695, %v1512_v45 }
 0x73b   : > { %2738 = vpow2.f32 %v1514_v46 }
 0x743   : > { %v1511_v47 = vpop.xlane.xlu1 %1510 }
 0x744   : > { %v1513_v17 = vsub.f32 %v1505_v41, %v1511_v47  ;;  %v428_v41 = vld [vmem:[#allocation12 + $0x10] sm:$0xff] }
 0x745   : > { %v2739_v50 = vpop.eup %2738  ;;  %v2610_v43 = vpack.c.bf16 %v429_v42, %v428_v41 }
 0x746   : > { %v1518_v51 = vsel %vm668_vm2, %v2739_v50, 0.0  ;;  %v1516_v18 = vmul.f32 1.442695, %v1513_v17 }
 0x747   : > { %1519 = vadd.xlane.f32.xlu0 %v1518_v51  ;;  %v1615_v52 = vpop.permute.xlu1 %1614 }
 0x748   : > { %2547 = vmatpush3.msra.mxu1 %v1615_v52  ;;  %2740 = vpow2.f32 %v1516_v18 }
 0x749   : > { %2556 = vmatprep.subr.mxu1 %v3050_v16 }
 0x74b   : > { %v1702_v58 = vpop.permute.xlu1 %1701 }
 0x74f   : > { %v1780_v61 = vpop.permute.xlu1 %1779 }
 0x752   : > { %v2741_v19 = vpop.eup %2740 }
 0x753   : > { %v1521_v53 = vsel %vm668_vm2, %v2741_v19, 0.0  ;;  %v1778_v63 = vpop.permute.xlu1 %1777 }
 0x75d   : > { %1539 = vrot.lane.b32.xlu0 %v3457_v49, %s3053_s16 }
 0x77c   : > { %1522 = vadd.xlane.f32.xlu0 %v1521_v53 }
 0x792   : > { %1699 = vrot.lane.b32.xlu0 %v3422_v20, %s3054_s17 }
 0x7d4   : > { %v1520_v54 = vpop.xlane.xlu0 %1519 }
 0x7d5   : > { %2742 = vrcp.f32 %v1520_v54 }
 0x7d8   : > { %v1540_v55 = vpop.permute.xlu0 %1539 }
 0x7d9   : > { %2542 = vmatpush3.msra.mxu0 %v1540_v55 }
 0x7da   : > { %2551 = vmatprep.subr.mxu0 %v3050_v16 }
 0x7df   : > { %v2743_v56 = vpop.eup %2742 }
 0x7e0   : > { %v3545_v57 = vmul.f32 %v2743_v56, %v2739_v50 }
 0x7e2   : > { %2544 = vmatmul.mubr.msk.f32.vlgmr.msra.gmra.mrb[10].mxu0 %vm668_vm2, %v3545_v57 }
 0x7e3   : > { %2552 = vmatpush3.xpose.msk.msra.mxu0 %vm668_vm2, %v1702_v58  ;;  %2553 = vmatprep.mubr.msk.f32.mxu0 %vm3051_vm1, %v3050_v16 }
 0x7e4   : > { %2561 = vmatprep.subr.mxu0 %v3050_v16 }
 0x809   : > { %v1523_v20 = vpop.xlane.xlu0 %1522 }
 0x80a   : > { %2744 = vrcp.f32 %v1523_v20 }
 0x80d   : > { %v1700_v59 = vpop.permute.xlu0 %1699 }
 0x80e   : > { %2554 = vmatmul.mubr.msk.f32.vlgmr.msra.gmra.mrb[12].mxu0 %vm668_vm2, %v1700_v59 }
 0x80f   : > { %2563 = vmatprep.mubr.msk.f32.mxu0 %vm3051_vm1, %v3050_v16 }
 0x814   : > { %v2745_v60 = vpop.eup %2744 }
 0x815   : > { %v3556_v62 = vmul.f32 %v2745_v60, %v2741_v19 }
 0x817   : > { %2549 = vmatmul.mubr.msk.f32.vlgmr.msra.gmra.mrb[16].mxu1 %vm668_vm2, %v3556_v62 }
 0x818   : > { %2557 = vmatpush3.xpose.msk.msra.mxu1 %vm668_vm2, %v1780_v61  ;;  %2558 = vmatprep.mubr.msk.f32.mxu1 %vm3051_vm1, %v3050_v16 }
 0x819   : > { %2566 = vmatprep.subr.mxu1 %v3050_v16 }
 0x81b   : > { %2559 = vmatmul.mubr.msk.f32.vlgmr.msra.gmra.mrb[18].mxu1 %vm668_vm2, %v1778_v63 }
 0x81c   : > { %2568 = vmatprep.mubr.msk.f32.mxu1 %vm3051_vm1, %v3050_v16 }
 0x8b5   : > { %v1610_v0 = vpop.f32.mrb[10].mxu0 }
 0x8b6   : > { %v2545_v1 = vpop.f32.mrb[11].mxu0 }
 0x8e1   : > { %v1773_v2 = vpop.f32.mrb[12].mxu0 }
 0x8e2   : > { %v1855_v3 = vmul.f32 0.35355338, %v1773_v2  ;;  %v2555_v4 = vpop.f32.mrb[13].mxu0 }
 0x8e4   : > { %v1857_v5 = vsel %vm668_vm2, %v1855_v3, -inf }
 0x8e5   : > { %1858 = vmax.xlane.f32.xlu0 %v1857_v5 }
 0x8ea   : > { %v1685_v6 = vpop.f32.mrb[16].mxu1 }
 0x8eb   : > { %v2550_v7 = vpop.f32.mrb[17].mxu1 }
 0x8ee   : > { %v1851_v8 = vpop.f32.mrb[18].mxu1 }
 0x8ef   : > { %v1856_v9 = vmul.f32 0.35355338, %v1851_v8  ;;  %v2560_v10 = vpop.f32.mrb[19].mxu1 }
 0x8f1   : > { %v1860_v11 = vsel %vm668_vm2, %v1856_v9, -inf }
 0x8f2   : > { %1861 = vmax.xlane.f32.xlu1 %v1860_v11 }
 0x903   : > { %1965 = vrot.lane.b32.xlu1 %v3455_v48, %s3054_s17 }
 0x907   : > { %1340 = vrot.lane.b32.xlu1 %v3523_v32, %s3055_s2 }
 0x90b   : > { %1342 = vrot.lane.b32.xlu1 %v3526_v38, %s3055_s2 }
 0x90f   : > { %1693 = vrot.lane.b32.xlu1 %v1685_v6, %s3056_s3 }
 0x972   : > { %v1859_v16 = vpop.xlane.xlu0 %1858 }
 0x973   : > { %v1863_v12 = vsub.f32 %v1855_v3, %v1859_v16 }
 0x975   : > { %v1865_v14 = vmul.f32 1.442695, %v1863_v12 }
 0x977   : > { %2746 = vpow2.f32 %v1865_v14 }
 0x97f   : > { %v1862_v15 = vpop.xlane.xlu1 %1861 }
 0x980   : > { %v1864_v21 = vsub.f32 %v1856_v9, %v1862_v15 }
 0x981   : > { %v2747_v22 = vpop.eup %2746 }
 0x982   : > { %v1867_v23 = vmul.f32 1.442695, %v1864_v21  ;;  %v1869_v48 = vsel %vm668_vm2, %v2747_v22, 0.0 }
 0x983   : > { %1870 = vadd.xlane.f32.xlu0 %v1869_v48  ;;  %v1966_v24 = vpop.permute.xlu1 %1965 }
 0x984   : > { %2748 = vpow2.f32 %v1867_v23  ;;  %2567 = vmatpush3.msra.mxu1 %v1966_v24 }
 0x987   : > { %v1341_v25 = vpop.permute.xlu1 %1340 }
 0x988   : > { %1346 = vst.msk [vmem:[#allocation2] sm:$0xff] %vm1183_vm3, %v1341_v25 }
 0x98b   : > { %v1343_v26 = vpop.permute.xlu1 %1342 }
 0x98c   : > { %1347 = vst.msk [vmem:[#allocation2 + $0x8] sm:$0xff] %vm1183_vm3, %v1343_v26 }
 0x98e   : > { %v2749_v27 = vpop.eup %2748 }
 0x98f   : > { %v1694_v28 = vpop.permute.xlu1 %1693  ;;  %v1872_v29 = vsel %vm668_vm2, %v2749_v27, 0.0 }
 0x990   : > { %1698 = vst.msk [vmem:[#allocation2 + $0x8] sm:$0xff] %vm1536_vm4, %v1694_v28  ;;  %1873 = vadd.xlane.f32.xlu0 %v1872_v29 }
 0x9a6   : > { %1890 = vrot.lane.b32.xlu0 %v3457_v49, %s3054_s17  ;;  %v426_v49 = vld [vmem:[#allocation12] sm:$0xff] }
 0x9a7   : > { %v2606_v40 = vpack.c.bf16 %v427_v39, %v426_v49 }
 0x9aa   : > { %1691 = vrot.lane.b32.xlu0 %v1610_v0, %s3056_s3 }
 0xa10   : > { %v1871_v31 = vpop.xlane.xlu0 %1870 }
 0xa11   : > { %2750 = vrcp.f32 %v1871_v31 }
 0xa1b   : > { %v2751_v33 = vpop.eup %2750 }
 0xa1c   : > { %v1876_v34 = vmul.f32 %v2751_v33, %v2747_v22 }
 0xa1d   : > { %v1874_v32 = vpop.xlane.xlu0 %1873 }
 0xa1e   : > { %2752 = vrcp.f32 %v1874_v32 }
 0xa21   : > { %v1891_v35 = vpop.permute.xlu0 %1890 }
 0xa22   : > { %2562 = vmatpush3.msra.mxu0 %v1891_v35 }
 0xa23   : > { %2564 = vmatmul.mubr.msk.f32.vlgmr.msra.gmra.mrb[14].mxu0 %vm668_vm2, %v1876_v34  ;;  %2607 = vmatprep.subr.bf16.mxu0 %v2606_v40 }
 0xa24   : > { %2609 = vmatpush3.bf16.msra.mxu0 %v2606_v40 }
 0xa25   : > { %v1692_v36 = vpop.permute.xlu0 %1691  ;;  %2611 = vmatprep.subr.bf16.mxu0 %v2610_v43 }
 0xa26   : > { %1697 = vst.msk [vmem:[#allocation2] sm:$0xff] %vm1536_vm4, %v1692_v36 }
 0xa28   : > { %v2753_v37 = vpop.eup %2752  ;;  %2613 = vmatpush3.bf16.msra.mxu0 %v2610_v43 }
 0xa29   : > { %v1878_v38 = vmul.f32 %v2753_v37, %v2749_v27 }
 0xa2b   : > { %2569 = vmatmul.mubr.msk.f32.vlgmr.msra.gmra.mrb[20].mxu1 %vm668_vm2, %v1878_v38 }
 0xaf6   : > { %v1961_v44 = vpop.f32.mrb[14].mxu0 }
 0xaf7   : > { %2042 = vrot.lane.b32.xlu0 %v1961_v44, %s3057_s23  ;;  %v2565_v45 = vpop.f32.mrb[15].mxu0 }
 0xafb   : > { %1177 = vrot.lane.b32.xlu0 %v3497_v13, %s3055_s2 }
 0xafe   : > { %v2036_v46 = vpop.f32.mrb[20].mxu1 }
 0xaff   : > { %1530 = vrot.lane.b32.xlu0 %v3545_v57, %s3056_s3  ;;  %2044 = vrot.lane.b32.xlu1 %v2036_v46, %s3057_s23  ;;  %v2570_v47 = vpop.f32.mrb[21].mxu1 }
 0xb03   : > { %1881 = vrot.lane.b32.xlu0 %v1876_v34, %s3057_s23  ;;  %1179 = vrot.lane.b32.xlu1 %v3512_v30, %s3055_s2 }
 0xb07   : > { %1532 = vrot.lane.b32.xlu1 %v3556_v62, %s3056_s3 }
 0xb0b   : > { %1883 = vrot.lane.b32.xlu1 %v1878_v38, %s3057_s23 }
 0xb69   : > { %v2043_v50 = vpop.permute.xlu0 %2042 }
 0xb6a   : > { %2048 = vst.msk [vmem:[#allocation2] sm:$0xff] %vm1887_vm5, %v2043_v50 }
 0xb6d   : > { %v1178_v13 = vpop.permute.xlu0 %1177 }
 0xb6e   : > { %1184 = vst.msk [vmem:[%s3463_s10] sm:$0xff] %vm1183_vm3, %v1178_v13 }
 0xb71   : > { %v1531_v51 = vpop.permute.xlu0 %1530  ;;  %v2045_v52 = vpop.permute.xlu1 %2044  ;;  %v2050_v30 = vld [vmem:[#allocation2] sm:$0xff] }
 0xb72   : > { %1537 = vst.msk [vmem:[%s3463_s10] sm:$0xff] %vm1536_vm4, %v1531_v51  ;;  %2579 = vmatprep.mubr.msk.f32.mxu0 %vm430_vm0, %v2050_v30 }
 0xb73   : > { %2049 = vst.msk [vmem:[#allocation2 + $0x8] sm:$0xff] %vm1887_vm5, %v2045_v52 }
 0xb75   : > { %v1882_v17 = vpop.permute.xlu0 %1881  ;;  %v1180_v18 = vpop.permute.xlu1 %1179 }
 0xb76   : > { %1888 = vst.msk [vmem:[%s3463_s10] sm:$0xff] %vm1887_vm5, %v1882_v17 }
 0xb77   : > { %1185 = vst.msk [vmem:[%s3463_s10 + $0x8] sm:$0xff] %vm1183_vm3, %v1180_v18 }
 0xb79   : > { %v1533_v19 = vpop.permute.xlu1 %1532 }
 0xb7a   : > { %v2051_v53 = vld [vmem:[#allocation2 + $0x8] sm:$0xff]  ;;  %1538 = vst.msk [vmem:[%s3463_s10 + $0x8] sm:$0xff] %vm1536_vm4, %v1533_v19 }
 0xb7b   : > { %2580 = vmatmul.mubr.msk.f32.vlgmr.msra.gmra.mrb[16].mxu0 %vm430_vm0, %v2051_v53 }
 0xb7d   : > { %v1884_v54 = vpop.permute.xlu1 %1883 }
 0xb7e   : > { %1889 = vst.msk [vmem:[%s3463_s10 + $0x8] sm:$0xff] %vm1887_vm5, %v1884_v54 }
 0xb7f   : > { %2939 = shalt.err (!%p2936_p8)
}
 0xb80   : > { %s2940_s10 = scalar_lea.hbm %s3617_s0, 256  ;;  %s2944_s3 = scalar_lea.hbm %s3713_s7, 512 }
 0xb81   : > { %p2941_p11 = scmp.ne.s32.totalorder %s3617_s0, %s2940_s10  ;;  %p2945_p1 = scmp.lt.u32.totalorder %s3617_s0, %s3713_s7 }
 0xb82   : > { %p2946_p2 = scmp.lt.u32.totalorder %s2944_s3, %s2940_s10  ;;  %p2948_p0 = scmp.lt.u32.totalorder %s2940_s10, %s3617_s0 }
 0xb83   : > { %p2942_p7 = pnand %p2941_p11, %p3272_p10 }
 0xb84   : > { %p2947_p13 = por %p2946_p2, %p2945_p1 }
 0xb85   : > { %p2943_p12 = pneg %p2942_p7 }
 0xb86   : > { %p2949_p4 = por %p2948_p0, %p2947_p13 }
 0xb88   : > { %p2950_p6 = pnand %p2949_p4, %p2943_p12 }
 0xb8a   : > { %2953 = shalt.err (!%p2950_p6)
}
 0xb8b   : > { %s3059_s14 = smov 128   ;;  %s398_s9 = scalar_lea.vmem [#allocation14], %s3370_s18 }
 0xb8c   : > { %2635 = dma.vmem_to_hbm [thread:$0]  (%p3272_p10), %s3620_s8, 256, %s3617_s0, %s2141_s21, %s3059_s14, %s3059_s14, %s3055_s2  }
 0xb8d   : > { %s2154_s13 = sshll.u32 %s398_s9, 4  ;;  %s3657_s10 = scalar_lea.hbm %s3712_s6, %s2400_s15  ;;  %s3650_s13 = int_to_ptr.vmem [resolvable:$true] %s2154_s13 }
 0xb8e   : > { %s2136_s0 = scalar_lea.sflag [#allocation5], %s3367_s12  ;;  %s2954_s18 = scalar_lea.vmem %s3650_s13, 256 }
 0xb8f   : > { %p2955_p3 = scmp.ne.s32.totalorder %s3650_s13, %s2954_s18  ;;  %s3060_s8 = smov [#allocation14]  }
 0xb90   : > { %s2958_s21 = sshll.u32 %s3060_s8, 4  ;;  %s2959_s21 = int_to_ptr.vmem [resolvable:$false] %s2958_s21 }
 0xb91   : > { %p2956_p5 = pnand %p2955_p3, %p3272_p10  ;;  %s2960_s28 = scalar_lea.vmem %s2959_s21, 512 }
 0xb92   : > { %p2961_p8 = scmp.lt.s32.totalorder %s3650_s13, %s2959_s21  ;;  %p2962_p11 = scmp.lt.s32.totalorder %s2960_s28, %s2954_s18 }
 0xb93   : > { %p2957_p9 = pneg %p2956_p5 }
 0xb94   : > { %p2963_p7 = por %p2962_p11, %p2961_p8 }
 0xb96   : > { %p2964_p12 = pnand %p2963_p7, %p2957_p9 }
 0xc4e   : > { %v2581_v55 = vpop.f32.mrb[16].mxu0 }
 0xc4f   : > { %2134 = vst.msk [vmem:[%s398_s9 + $0x8] sm:$0xff] %vm430_vm0, %v2581_v55  ;;  %v2124_v56 = vpop.f32.mrb[17].mxu0 }
 0xc50   : > { %2133 = vst.msk [vmem:[%s398_s9] sm:$0xff] %vm430_vm0, %v2124_v56 }
 0xc51   : > { %2967 = shalt.err (!%p2964_p12)
}
 0xc52   : > { %s2968_s15 = scalar_lea.hbm %s3657_s10, 256  ;;  %s2972_s3 = scalar_lea.hbm %s3712_s6, 512 }
 0xc53   : > { %p2969_p1 = scmp.ne.s32.totalorder %s3657_s10, %s2968_s15  ;;  %p2973_p0 = scmp.lt.u32.totalorder %s3657_s10, %s3712_s6 }
 0xc54   : > { %p2974_p4 = scmp.lt.u32.totalorder %s2972_s3, %s2968_s15  ;;  %p2976_p3 = scmp.lt.u32.totalorder %s2968_s15, %s3657_s10 }
 0xc55   : > { %p2970_p2 = pnand %p2969_p1, %p3272_p10 }
 0xc56   : > { %p2975_p6 = por %p2974_p4, %p2973_p0 }
 0xc57   : > { %p2971_p13 = pneg %p2970_p2 }
 0xc58   : > { %p2977_p5 = por %p2976_p3, %p2975_p6 }
 0xc5a   : > { %p2978_p9 = pnand %p2977_p5, %p2971_p13 }
 0xc5c   : > { %2981 = shalt.err (!%p2978_p9)
}
 0xc5d   : > { %2634 = dma.vmem_to_hbm [thread:$0]  (%p3272_p10), %s3650_s13, 256, %s3657_s10, %s2136_s0, %s3059_s14, %s3059_s14, %s3055_s2  }
 0xc5e PF: > { %s3747_s9 = sld [smem:[#allocation24_spill]]  ;;  %s2185_s29 = sand.u32 1, %s3028_s24  }
 0xc5f   : > { %p3749_p11 = scmp.ge.s32.totalorder %s3040_s27, 2  ;;  %s2186_s30 = scalar_lea.sflag [#allocation5], %s2185_s29 }
 0xc64   : > { %p3748_p8 = scmp.ne.s32.totalorder %s3747_s9, 0 }
 0xc66   : > { %p2659_p7 = pnand %p3749_p11, %p3748_p8 }
 0xc68   : > { %3019 = dma.done.wait (!%p2659_p7), %s2186_s30, 256  }
 0xc69   : > { %3021 = vsyncadd (!%p2659_p7), %s2186_s30, 4294967040  ;;  %s2195_s19 = scalar_lea.sflag [#allocation16], %s2185_s29 }
 0xc6a   : > { %3023 = dma.done.wait (!%p2659_p7), %s2195_s19, 256  }
 0xc6b   : > { %3025 = vsyncadd (!%p2659_p7), %s2195_s19, 4294967040  ;;  %p29_p10 = scmp.ge.s32.totalorder %s3262_s22, 4   ;;  %s3750_s24 = smov %s3032_s25 }
 0xc6c   : > { %s3751_s25 = smov %s3036_s26  ;;  %s3752_s26 = smov %s3278_s20 }
 0xc6d   : > { %s3753_s27 = smov %s3262_s22  ;;  %31 = sbr.rel (!%p29_p10) target bundleno = 15 (0xf), region = 135 }
 0xc74   :  { %2200 = vsyncpa [#allocation4], 1 }
 0xc75   :  { %2202 = vsyncpa [#allocation4 + $0x1], 1 }
 0xc76   :  { %2203 = vsyncpa [#allocation7], 1 }
 0xc77   :  { %2205 = vsyncpa [#allocation7 + $0x1], 1 }
 0xc78   :  { %2206 = vsyncpa [#allocation10], 1 }
 0xc79   :  { %2207 = vsyncpa [#allocation13], 1 }
 0xc7a   :  { %2208 = vsyncpa [#allocation5], 1 }
 0xc7b   :  { %2210 = vsyncpa [#allocation5 + $0x1], 1 }
 0xc7c   :  { %2211 = vsyncpa [#allocation16], 1 }
 0xc7d   :  { %2213 = vsyncpa [#allocation16 + $0x1], 1 }

</bundles_post_ra>
